<compile_context>
chip_gen: v7x
topology: tpu7x:2x2x1
jax: 0.10.0
libtpu: 0.0.40
codegen_flags: <defaults>
</compile_context>

<pallas_src>
import jax
import jax.numpy as jnp
from jax.experimental import pallas as pl
from jax.experimental.pallas import tpu as pltpu

_EPS = 1e-12  # matches torch F.normalize default eps


def _netvlad_kernel(x_ref, w_ref, c_ref, out_ref):
    # x_ref:   (B, S, D)  descriptors, D lane-dense
    # w_ref:   (K, D)     bf16 1x1-conv weights (soft-assignment projection)
    # c_ref:   (K, D)     f32 cluster centroids
    # out_ref: (B, K, D)  normalized VLAD matrices for these B samples
    B, S, D = x_ref.shape
    K = w_ref.shape[0]

    x = x_ref[...].astype(jnp.float32).reshape(B * S, D)       # (B*S, D) f32
    c = c_ref[...]                                              # (K, D)   f32

    # --- descriptor-wise L2 normalization (over D), rsqrt on the EUP ---
    sumsq = jnp.sum(x * x, axis=-1, keepdims=True)
    xn = x * jax.lax.rsqrt(jnp.maximum(sumsq, _EPS * _EPS))     # (B*S, D) f32

    # --- soft assignment: one (B*S, D) x (D, K) MXU matmul, bf16 operands ---
    logits = jax.lax.dot_general(
        xn.astype(jnp.bfloat16), w_ref[...],
        dimension_numbers=(((1,), (1,)), ((), ())),
        preferred_element_type=jnp.float32)                     # (B*S, K)
    logits = logits - jnp.max(logits, axis=-1, keepdims=True)
    e = jnp.exp(logits)
    a = e * pl.reciprocal(jnp.sum(e, axis=-1, keepdims=True), approx=True)

    # --- VLAD aggregation (per sample, batched MXU matmul, f32 operands) ---
    # vlad[b,k,d] = sum_s a[b,s,k]*xn[b,s,d] - c[k,d]*sum_s a[b,s,k]
    a3 = a.reshape(B, S, K)                                     # (B, S, K)
    xn_b = xn.reshape(B, S, D)                                  # (B, S, D)
    # NOTE: the (B,S,K)->(B,K,S) transpose is tiny (B*S*K elements) at these
    # shapes; keeping the batched matmul in canonical NN form is the safe,
    # always-lowerable layout on Mosaic.
    at = jnp.transpose(a3, (0, 2, 1))                           # (B, K, S)
    awx = jax.lax.dot_general(
        at, xn_b,
        dimension_numbers=(((2,), (1,)), ((0,), (0,))),
        preferred_element_type=jnp.float32)                     # (B, K, D)
    asum = jnp.sum(a3, axis=1)[:, :, None]                      # (B, K, 1)
    vlad = awx - c[None, :, :] * asum                           # (B, K, D)

    # --- intra-cluster L2 normalization (over D) ---
    vsq = jnp.sum(vlad * vlad, axis=-1, keepdims=True)          # (B, K, 1)
    inv = jax.lax.rsqrt(jnp.maximum(vsq, _EPS * _EPS))          # (B, K, 1)
    vlad = vlad * inv

    # --- global L2 normalization (over flattened K*D, per sample) ---
    # Squared norm of each normalized row is vsq*inv^2; reuse it instead of
    # re-squaring the full (B, K, D) tensor (saves a VPU pass + XLU reduce).
    gsq = jnp.sum(vsq * inv * inv, axis=1, keepdims=True)       # (B, 1, 1)
    vlad = vlad * jax.lax.rsqrt(jnp.maximum(gsq, _EPS * _EPS))

    out_ref[...] = vlad.astype(out_ref.dtype)


def _chip_vmem_info():
    """Returns (per-core VMEM bytes, is_multi_tensorcore_chip)."""
    cap = 128 << 20
    try:
        cap = int(getattr(pltpu.get_tpu_info(), "vmem_capacity_bytes", cap))
    except Exception:
        pass
    # v7x exposes 64 MiB per TensorCore and has 2 TCs per chip (megacore);
    # v5e/v6e have 128 MiB and a single TC.
    return cap, cap <= (64 << 20)


def _step_vmem_bytes(b, s, k, d):
    in_blk = b * s * d * 4                # x block (f32), double buffered
    out_blk = b * k * d * 4               # out block (f32), double buffered
    fixed = k * d * (2 + 4)               # w (bf16) + centroids (f32)
    inter = 8 * b * max(s, k) * d * 4     # generous bound on f32 intermediates
    return 2 * (in_blk + out_blk + fixed) + inter


def _pick_block_batch(n, s, k, d, *, multi_tc, vmem_budget, target_rows=512):
    """Samples per grid step: fill the MXU M-dim (B*S rows up to target_rows),
    stay inside the VMEM budget, and only enforce >= 2 grid steps on
    multi-TC chips (v7x) so both cores get work."""
    b = max(1, min(n, max(1, target_rows // max(s, 1))))
    while b > 1 and _step_vmem_bytes(b, s, k, d) > vmem_budget:
        b -= 1
    min_steps = 2 if multi_tc else 1
    while b > 1 and (n % b != 0 or n // b < min_steps):
        b -= 1
    return b


def netvlad_forward(x_nchw, conv_w, centroids):
    """x_nchw: (N, D, H, W); conv_w: (K, D); centroids: (K, D) -> (N, K*D)."""
    N, D, H, W = x_nchw.shape
    K = conv_w.shape[0]
    S = H * W

    # One-time HBM-level transpose so D is lane-dense inside the kernel; one
    # extra pass over x is far cheaper than an ~8x lane-padded (B, D, S)
    # input block plus an in-kernel XLU transpose every step when S < 128.
    x_sd = jnp.transpose(x_nchw.reshape(N, D, S), (0, 2, 1))    # (N, S, D)
    w_bf16 = conv_w.astype(jnp.bfloat16)
    c_f32 = centroids.astype(jnp.float32)

    vmem_cap, multi_tc = _chip_vmem_info()
    vmem_budget = max(vmem_cap - (16 << 20), vmem_cap // 2)
    B = _pick_block_batch(N, S, K, D, multi_tc=multi_tc, vmem_budget=vmem_budget)
    vmem_limit = int(min(vmem_budget,
                         max(32 << 20, 2 * _step_vmem_bytes(B, S, K, D))))

    # TODO(synk): for production shapes (S in the hundreds/thousands), add a
    # second "arbitrary" grid axis over S with VMEM accumulators for awx/asum
    # (pl.when init at step 0, normalizations + store at the last step) so the
    # per-step VMEM footprint stays bounded on v7x's 64 MiB.
    vlad = pl.pallas_call(
        _netvlad_kernel,
        out_shape=jax.ShapeDtypeStruct((N, K, D), x_nchw.dtype),
        grid_spec=pltpu.PrefetchScalarGridSpec(
            num_scalar_prefetch=0,
            grid=(N // B,),
            in_specs=[
                pl.BlockSpec((B, S, D), lambda n: (n, 0, 0)),
                pl.BlockSpec((K, D), lambda n: (0, 0)),
                pl.BlockSpec((K, D), lambda n: (0, 0)),
            ],
            out_specs=pl.BlockSpec((B, K, D), lambda n: (n, 0, 0)),
        ),
        compiler_params=pltpu.CompilerParams(
            dimension_semantics=("parallel",),
            vmem_limit_bytes=vmem_limit),
    )(x_sd, w_bf16, c_f32)

    return vlad.reshape(N, K * D)


def _netvlad_ref(x_nchw, conv_w, centroids):
    """Pure-JAX f32 reference reproducing the PyTorch forward."""
    N, D, H, W = x_nchw.shape
    nrm = jnp.sqrt(jnp.sum(x_nchw * x_nchw, axis=1, keepdims=True))
    xn = x_nchw / jnp.maximum(nrm, _EPS)                        # (N, D, H, W)
    x_flat = xn.reshape(N, D, -1)                               # (N, D, S)
    logits = jnp.einsum("kd,nds->nks", conv_w, x_flat)          # (N, K, S)
    a = jax.nn.softmax(logits, axis=1)                          # (N, K, S)
    vlad = jnp.einsum("nks,nds->nkd", a, x_flat) \
        - centroids[None] * jnp.sum(a, axis=-1)[..., None]      # (N, K, D)
    vnrm = jnp.sqrt(jnp.sum(vlad * vlad, axis=2, keepdims=True))
    vlad = vlad / jnp.maximum(vnrm, _EPS)
    vlad = vlad.reshape(N, -1)
    gnrm = jnp.sqrt(jnp.sum(vlad * vlad, axis=1, keepdims=True))
    return vlad / jnp.maximum(gnrm, _EPS)


if __name__ == "__main__":
    # Small shapes consistent with the module defaults:
    # batch=8, dim(D)=128, clusters(K)=64, spatial 4x4 (S=16).
    N, D, K, H, W = 8, 128, 64, 4, 4

    key = jax.random.PRNGKey(0)
    kx, kw, kc = jax.random.split(key, 3)
    x = jax.random.normal(kx, (N, D, H, W), dtype=jnp.float32)
    # Deterministic parameter init (shapes per nn.Conv2d(D, K, 1, bias=False)
    # squeezed to (K, D), and centroids = torch.rand(K, D)-like uniform).
    conv_w = jax.random.normal(kw, (K, D), dtype=jnp.float32) * 0.05
    centroids = jax.random.uniform(kc, (K, D), dtype=jnp.float32)

    out = netvlad_forward(x, conv_w, centroids)
    out = jax.block_until_ready(out)

    ref = _netvlad_ref(x, conv_w, centroids)
    assert out.shape == (N, K * D)
    # Tolerance covers bf16 soft-assignment matmul operands + approx softmax
    # reciprocal; aggregation and all normalizations run in f32.
    assert jnp.allclose(out, ref, atol=2e-2, rtol=2e-2), "mismatch vs reference"

    print("KERNEL_OK")
</pallas_src>

<mosaic_0001>
module attributes {stable_mosaic.version = 11 : i64} {
  func.func @_netvlad_kernel(%arg0: i32, %arg1: memref<8x16x128xf32, #tpu.memory_space<vmem>>, %arg2: memref<64x128xbf16, #tpu.memory_space<vmem>>, %arg3: memref<64x128xf32, #tpu.memory_space<vmem>>, %arg4: memref<8x64x128xf32, #tpu.memory_space<vmem>>) attributes {dimension_semantics = [#tpu.dimension_semantics<parallel>], iteration_bounds = array<i64: 1>, scalar_prefetch = 0 : i64, scratch_operands = 0 : i64, tpu.core_type = #tpu.core_type<tc>, window_params = [{transform_indices = @transform_0, window_bounds = array<i64: 8, 16, 128>}, {pipeline_mode = #tpu.pipeline_mode<synchronous>, transform_indices = @transform_1, window_bounds = array<i64: 64, 128>}, {pipeline_mode = #tpu.pipeline_mode<synchronous>, transform_indices = @transform_2, window_bounds = array<i64: 64, 128>}, {transform_indices = @transform_3, window_bounds = array<i64: 8, 64, 128>}]} {
    %c0 = arith.constant 0 : index
    %c0_0 = arith.constant 0 : index
    %c0_1 = arith.constant 0 : index
    %0 = vector.load %arg1[%c0, %c0_0, %c0_1] : memref<8x16x128xf32, #tpu.memory_space<vmem>>, vector<8x16x128xf32>
    %1 = vector.shape_cast %0 : vector<8x16x128xf32> to vector<128x128xf32>
    %c0_2 = arith.constant 0 : index
    %c0_3 = arith.constant 0 : index
    %2 = vector.load %arg3[%c0_2, %c0_3] : memref<64x128xf32, #tpu.memory_space<vmem>>, vector<64x128xf32>
    %3 = arith.mulf %1, %1 : vector<128x128xf32>
    %cst = arith.constant dense<0.000000e+00> : vector<128xf32>
    %4 = vector.multi_reduction <add>, %3, %cst [1] : vector<128x128xf32> to vector<128xf32>
    %5 = vector.shape_cast %4 : vector<128xf32> to vector<128x1xf32>
    %cst_4 = arith.constant 1.000000e-24 : f32
    %6 = vector.broadcast %cst_4 : f32 to vector<128x1xf32>
    %7 = arith.maximumf %5, %6 : vector<128x1xf32>
    %8 = math.rsqrt %7 : vector<128x1xf32>
    %9 = vector.broadcast %8 : vector<128x1xf32> to vector<128x128xf32>
    %10 = arith.mulf %1, %9 : vector<128x128xf32>
    %11 = arith.truncf %10 : vector<128x128xf32> to vector<128x128xbf16>
    %c0_5 = arith.constant 0 : index
    %c0_6 = arith.constant 0 : index
    %12 = vector.load %arg2[%c0_5, %c0_6] : memref<64x128xbf16, #tpu.memory_space<vmem>>, vector<64x128xbf16>
    %cst_7 = arith.constant dense<0.000000e+00> : vector<128x64xf32>
    %13 = tpu.matmul %11, %12, %cst_7 {dimension_numbers = #tpu.dot_dimension_numbers<[1], [1], [0], [0], [0, 0, 1, 0], [], []>} : vector<128x128xbf16>, vector<64x128xbf16>, vector<128x64xf32> -> vector<128x64xf32>
    %cst_8 = arith.constant dense<0xFF800000> : vector<128xf32>
    %14 = vector.multi_reduction <maximumf>, %13, %cst_8 [1] : vector<128x64xf32> to vector<128xf32>
    %15 = vector.shape_cast %14 : vector<128xf32> to vector<128x1xf32>
    %16 = vector.broadcast %15 : vector<128x1xf32> to vector<128x64xf32>
    %17 = arith.subf %13, %16 : vector<128x64xf32>
    %18 = math.exp %17 : vector<128x64xf32>
    %cst_9 = arith.constant dense<0.000000e+00> : vector<128xf32>
    %19 = vector.multi_reduction <add>, %18, %cst_9 [1] : vector<128x64xf32> to vector<128xf32>
    %20 = vector.shape_cast %19 : vector<128xf32> to vector<128x1xf32>
    %21 = tpu.reciprocal %20 {approx = true} : vector<128x1xf32> -> vector<128x1xf32>
    %22 = vector.broadcast %21 : vector<128x1xf32> to vector<128x64xf32>
    %23 = arith.mulf %18, %22 : vector<128x64xf32>
    %24 = vector.shape_cast %23 : vector<128x64xf32> to vector<8x16x64xf32>
    %25 = vector.shape_cast %10 : vector<128x128xf32> to vector<8x16x128xf32>
    %26 = tpu.transpose %24, [0, 2, 1] : vector<8x16x64xf32> -> vector<8x64x16xf32>
    %cst_10 = arith.constant dense<0.000000e+00> : vector<8x64x128xf32>
    %27 = tpu.matmul %26, %25, %cst_10 {dimension_numbers = #tpu.dot_dimension_numbers<[2], [1], [1], [2], [0, 0, 0, 1, 1, 2], [0], [0]>} : vector<8x64x16xf32>, vector<8x16x128xf32>, vector<8x64x128xf32> -> vector<8x64x128xf32>
    %cst_11 = arith.constant dense<0.000000e+00> : vector<8x64xf32>
    %28 = vector.multi_reduction <add>, %24, %cst_11 [1] : vector<8x16x64xf32> to vector<8x64xf32>
    %29 = vector.shape_cast %28 : vector<8x64xf32> to vector<8x64x1xf32>
    %30 = vector.shape_cast %2 : vector<64x128xf32> to vector<1x64x128xf32>
    %31 = vector.broadcast %30 : vector<1x64x128xf32> to vector<8x64x128xf32>
    %32 = vector.broadcast %29 : vector<8x64x1xf32> to vector<8x64x128xf32>
    %33 = arith.mulf %31, %32 : vector<8x64x128xf32>
    %34 = arith.subf %27, %33 : vector<8x64x128xf32>
    %35 = arith.mulf %34, %34 : vector<8x64x128xf32>
    %cst_12 = arith.constant dense<0.000000e+00> : vector<8x64xf32>
    %36 = vector.multi_reduction <add>, %35, %cst_12 [2] : vector<8x64x128xf32> to vector<8x64xf32>
    %37 = vector.shape_cast %36 : vector<8x64xf32> to vector<8x64x1xf32>
    %cst_13 = arith.constant 1.000000e-24 : f32
    %38 = vector.broadcast %cst_13 : f32 to vector<8x64x1xf32>
    %39 = arith.maximumf %37, %38 : vector<8x64x1xf32>
    %40 = math.rsqrt %39 : vector<8x64x1xf32>
    %41 = vector.broadcast %40 : vector<8x64x1xf32> to vector<8x64x128xf32>
    %42 = arith.mulf %34, %41 : vector<8x64x128xf32>
    %43 = arith.mulf %37, %40 : vector<8x64x1xf32>
    %44 = arith.mulf %43, %40 : vector<8x64x1xf32>
    %cst_14 = arith.constant dense<0.000000e+00> : vector<8x1xf32>
    %45 = vector.multi_reduction <add>, %44, %cst_14 [1] : vector<8x64x1xf32> to vector<8x1xf32>
    %46 = vector.shape_cast %45 : vector<8x1xf32> to vector<8x1x1xf32>
    %cst_15 = arith.constant 1.000000e-24 : f32
    %47 = vector.broadcast %cst_15 : f32 to vector<8x1x1xf32>
    %48 = arith.maximumf %46, %47 : vector<8x1x1xf32>
    %49 = math.rsqrt %48 : vector<8x1x1xf32>
    %50 = vector.broadcast %49 : vector<8x1x1xf32> to vector<8x64x128xf32>
    %51 = arith.mulf %42, %50 : vector<8x64x128xf32>
    %c0_16 = arith.constant 0 : index
    %c0_17 = arith.constant 0 : index
    %c0_18 = arith.constant 0 : index
    %52 = vector.load %arg4[%c0_16, %c0_17, %c0_18] : memref<8x64x128xf32, #tpu.memory_space<vmem>>, vector<8x64x128xf32>
    tpu.vector_store %arg4[%c0_16, %c0_17, %c0_18], %51 {strides = array<i32>} : memref<8x64x128xf32, #tpu.memory_space<vmem>>, vector<8x64x128xf32>,
    return
  }
  func.func @transform_0(%arg0: i32) -> (i32, i32, i32) {
    %c0_i32 = arith.constant 0 : i32
    %c0_i32_0 = arith.constant 0 : i32
    %c0_i32_1 = arith.constant 0 : i32
    return %arg0, %c0_i32, %c0_i32_0 : i32, i32, i32
  }
  func.func @transform_1(%arg0: i32) -> (i32, i32) {
    %c0_i32 = arith.constant 0 : i32
    %c0_i32_0 = arith.constant 0 : i32
    %c0_i32_1 = arith.constant 0 : i32
    return %c0_i32, %c0_i32_0 : i32, i32
  }
  func.func @transform_2(%arg0: i32) -> (i32, i32) {
    %c0_i32 = arith.constant 0 : i32
    %c0_i32_0 = arith.constant 0 : i32
    %c0_i32_1 = arith.constant 0 : i32
    return %c0_i32, %c0_i32_0 : i32, i32
  }
  func.func @transform_3(%arg0: i32) -> (i32, i32, i32) {
    %c0_i32 = arith.constant 0 : i32
    %c0_i32_0 = arith.constant 0 : i32
    %c0_i32_1 = arith.constant 0 : i32
    return %arg0, %c0_i32, %c0_i32_0 : i32, i32, i32
  }
}

</mosaic_0001>

<bundles_post_ra>
// kernel: tpu_custom_call.1
= control target key start
LH: loop header
LB: loop body
LE: loop exit
PB: predicated region body
PF: predicated region fallthrough
CT: control target
= control target key end

     0   :  { %8 = vsyncpa [#allocation3], 0  ;;  %s5467_s0 = inlined_call_operand.hbm [shape: f32[8,16,128], index: 0, kind: input, shape index: {}]   ;;  %s5468_s1 = inlined_call_operand.hbm [shape: bf16[64,128], index: 1, kind: input, shape index: {}]   ;;  %s5469_s2 = inlined_call_operand.hbm [shape: f32[64,128], index: 2, kind: input, shape index: {}]   ;;  %s5470_s3 = inlined_call_operand.hbm [shape: f32[8,64,128], index: 3, kind: output, shape index: {}]  }
   0x1   :  { %9 = vsyncpa [#allocation6], 0 }
   0x2   :  { %10 = vsyncpa [#allocation4], 0  ;;  %s3697_s12 = smov [#allocation5]   ;;  %s3603_s16 = scalar_lea.hbm %s5468_s1, 512 }
   0x3   :  { %s28_s13 = sshll.u32 %s3697_s12, 4  ;;  %p3604_p0 = scmp.ne.s32.totalorder %s5468_s1, %s3603_s16  ;;  %s29_s13 = int_to_ptr.vmem [resolvable:$true] %s28_s13 }
   0x4   :  { %p3607_p1 = scmp.lt.u32.totalorder %s3603_s16, %s5468_s1 }
   0x6   :  { %p3609_p2 = pnand %p3607_p1, %p3604_p0 }
   0x8   :  { %3612 = shalt.err (!%p3609_p2)
}
   0x9   :  { %s3613_s21 = scalar_lea.vmem %s29_s13, 512  ;;  %p3618_p4 = scmp.lt.s32.totalorder %s29_s13, %s29_s13 }
   0xa   :  { %p3614_p3 = scmp.ne.s32.totalorder %s29_s13, %s3613_s21  ;;  %p3619_p5 = scmp.lt.s32.totalorder %s3613_s21, %s3613_s21 }
   0xc   :  { %p3620_p6 = por %p3619_p5, %p3618_p4 }
   0xe   :  { %p3621_p7 = pnand %p3620_p6, %p3614_p3 }
  0x10   :  { %3624 = shalt.err (!%p3621_p7)
}
  0x11   :  { %s3698_s22 = smov 64   ;;  %s3699_s23 = smov 4  }
  0x12   :  { %34 = dma.hbm_to_vmem [thread:$0]  %s5468_s1, 512, %s29_s13, [#allocation6], %s3698_s22, %s3698_s22, %s3699_s23  }
  0x13   :  { %s3700_s26 = smov [#allocation2]   ;;  %s3625_s30 = scalar_lea.hbm %s5467_s0, 2048 }
  0x14   :  { %s16_s27 = sshll.u32 %s3700_s26, 4  ;;  %p3626_p8 = scmp.ne.s32.totalorder %s5467_s0, %s3625_s30  ;;  %s17_s27 = int_to_ptr.vmem [resolvable:$true] %s16_s27 }
  0x15   :  { %p3629_p9 = scmp.lt.u32.totalorder %s3625_s30, %s5467_s0 }
  0x17   :  { %p3631_p10 = pnand %p3629_p9, %p3626_p8 }
  0x19   :  { %3634 = shalt.err (!%p3631_p10)
}
  0x1a   :  { %s3635_s8 = scalar_lea.vmem %s17_s27, 2048  ;;  %p3640_p12 = scmp.lt.s32.totalorder %s17_s27, %s17_s27 }
  0x1b   :  { %p3636_p11 = scmp.ne.s32.totalorder %s17_s27, %s3635_s8  ;;  %p3641_p13 = scmp.lt.s32.totalorder %s3635_s8, %s3635_s8 }
  0x1d   :  { %p3642_p0 = por %p3641_p13, %p3640_p12 }
  0x1f   :  { %p3643_p1 = pnand %p3642_p0, %p3636_p11 }
  0x21   :  { %3646 = shalt.err (!%p3643_p1)
}
  0x22   :  { %s3701_s1 = smov 128   ;;  %s3702_s9 = smov 8  }
  0x23   :  { %22 = dma.hbm_to_vmem [thread:$0]  %s5467_s0, 2048, %s17_s27, [#allocation3], %s3701_s1, %s3701_s1, %s3702_s9  }
  0x24   :  { %s3703_s12 = smov [#allocation7]   ;;  %s3647_s16 = scalar_lea.hbm %s5469_s2, 1024 }
  0x25   :  { %s40_s13 = sshll.u32 %s3703_s12, 4  ;;  %p3648_p2 = scmp.ne.s32.totalorder %s5469_s2, %s3647_s16  ;;  %s41_s13 = int_to_ptr.vmem [resolvable:$true] %s40_s13 }
  0x26   :  { %p3651_p3 = scmp.lt.u32.totalorder %s3647_s16, %s5469_s2 }
  0x28   :  { %p3653_p4 = pnand %p3651_p3, %p3648_p2 }
  0x2a   :  { %3656 = shalt.err (!%p3653_p4)
}
  0x2b   :  { %s3657_s21 = scalar_lea.vmem %s41_s13, 1024  ;;  %p3662_p6 = scmp.lt.s32.totalorder %s41_s13, %s41_s13 }
  0x2c   :  { %p3658_p5 = scmp.ne.s32.totalorder %s41_s13, %s3657_s21  ;;  %p3663_p7 = scmp.lt.s32.totalorder %s3657_s21, %s3657_s21 }
  0x2e   :  { %p3664_p8 = por %p3663_p7, %p3662_p6 }
  0x30   :  { %p3665_p9 = pnand %p3664_p8, %p3658_p5 }
  0x32   :  { %3668 = shalt.err (!%p3665_p9)
}
  0x33   :  { %46 = dma.hbm_to_vmem [thread:$0]  %s5469_s2, 1024, %s41_s13, [#allocation6], %s3701_s1, %s3701_s1, %s3702_s9  }
  0x34   :  { %3691 = dma.done.wait [#allocation3], 2048  }
  0x35   :  { %3692 = vsyncadd [#allocation3], 4294965248 }
  0x36   :  { %3693 = dma.done.wait [#allocation6], 1536  }
  0x37   :  { %3694 = vsyncadd [#allocation6], 4294965760  ;;  %v3767_v0 = vld [vmem:[#allocation2 + $0x10] sm:$0xff]  ;;  %v3769_v1 = vld [vmem:[#allocation2] sm:$0xff]  ;;  %vm314_vm0 = vcmask 523264   ;;  %vm747_vm1 = vcmask 130048  }
  0x38   :  { %v3771_v2 = vld [vmem:[#allocation2 + $0x18] sm:$0xff]  ;;  %v83_v3 = vmul.f32 %v3767_v0, %v3767_v0  ;;  %v81_v4 = vmul.f32 %v3769_v1, %v3769_v1  ;;  %v3777_v5 = vld [vmem:[#allocation2 + $0x8] sm:$0xff]  ;;  %v3785_v9 = vld [vmem:[#allocation2 + $0x20] sm:$0xff]  ;;  %s3704_s2 = smov [#allocation8]  }
  0x39   :  { %v84_v6 = vmul.f32 %v3771_v2, %v3771_v2  ;;  %v82_v7 = vmul.f32 %v3777_v5, %v3777_v5  ;;  %v3783_v8 = vld [vmem:[#allocation2 + $0x28] sm:$0xff]  ;;  %v3787_v10 = vld [vmem:[#allocation2 + $0x38] sm:$0xff]  ;;  %v3359_v11 = vld [vmem:[#allocation5] sm:$0xff]   ;;  %v85_v13 = vmul.f32 %v3785_v9, %v3785_v9  ;;  %s2993_s23 = sshll.u32 %s3704_s2, 4  ;;  %s2994_s23 = int_to_ptr.vmem [resolvable:$true] %s2993_s23 }
  0x3a   :  { %101 = vadd.xlane.f32.xlu1 %v83_v3  ;;  %97 = vadd.xlane.f32.xlu0 %v81_v4  ;;  %v86_v12 = vmul.f32 %v3783_v8, %v3783_v8  ;;  %v3360_v14 = vld [vmem:[#allocation5 + $0x8] sm:$0xff]   ;;  %v3793_v15 = vld [vmem:[#allocation2 + $0x30] sm:$0xff]  ;;  %v88_v16 = vmul.f32 %v3787_v10, %v3787_v10  ;;  %v3801_v19 = vld [vmem:[#allocation2 + $0x40] sm:$0xff]  ;;  %s3669_s24 = scalar_lea.vmem %s2994_s23, 8192  ;;  %p3674_p11 = scmp.lt.s32.totalorder %s2994_s23, %s2994_s23 }
  0x3b   :  { %3166 = vmatprep.subr.bf16.mxu0 %v3359_v11  ;;  %v87_v17 = vmul.f32 %v3793_v15, %v3793_v15  ;;  %v3799_v18 = vld [vmem:[#allocation2 + $0x48] sm:$0xff]  ;;  %v89_v21 = vmul.f32 %v3801_v19, %v3801_v19  ;;  %v3807_v22 = vld [vmem:[#allocation2 + $0x58] sm:$0xff]  ;;  %v3809_v23 = vld [vmem:[#allocation2 + $0x50] sm:$0xff]  ;;  %p3670_p10 = scmp.ne.s32.totalorder %s2994_s23, %s3669_s24  ;;  %p3675_p12 = scmp.lt.s32.totalorder %s3669_s24, %s3669_s24 }
  0x3c   :  { %3167 = vmatpush3.bf16.xpose.msra.mxu0 %v3359_v11  ;;  %v90_v20 = vmul.f32 %v3799_v18, %v3799_v18  ;;  %v92_v24 = vmul.f32 %v3807_v22, %v3807_v22  ;;  %v91_v25 = vmul.f32 %v3809_v23, %v3809_v23  ;;  %v3815_v26 = vld [vmem:[#allocation2 + $0x68] sm:$0xff]  ;;  %v3817_v27 = vld [vmem:[#allocation2 + $0x60] sm:$0xff]  ;;  %v3361_v28 = vld [vmem:[#allocation5 + $0x10] sm:$0xff]  }
  0x3d   :  { %3168 = vmatprep.subr.bf16.mxu0 %v3360_v14  ;;  %v94_v29 = vmul.f32 %v3815_v26, %v3815_v26  ;;  %v93_v30 = vmul.f32 %v3817_v27, %v3817_v27  ;;  %v3823_v31 = vld [vmem:[#allocation2 + $0x78] sm:$0xff]  ;;  %v3825_v32 = vld [vmem:[#allocation2 + $0x70] sm:$0xff]  ;;  %p3676_p13 = por %p3675_p12, %p3674_p11 }
  0x3e   :  { %103 = vadd.xlane.f32.xlu1 %v84_v6  ;;  %99 = vadd.xlane.f32.xlu0 %v82_v7  ;;  %v96_v33 = vmul.f32 %v3823_v31, %v3823_v31  ;;  %v95_v34 = vmul.f32 %v3825_v32, %v3825_v32  ;;  %v3362_v35 = vld [vmem:[#allocation5 + $0x18] sm:$0xff]  }
  0x3f   :  { %p3677_p0 = pnand %p3676_p13, %p3670_p10 }
  0x42   :  { %107 = vadd.xlane.f32.xlu1 %v86_v12  ;;  %105 = vadd.xlane.f32.xlu0 %v85_v13 }
  0x44   :  { %3169 = vmatpush3.bf16.xpose.msra.mxu0 %v3360_v14 }
  0x45   :  { %3170 = vmatprep.subr.bf16.mxu0 %v3361_v28 }
  0x46   :  { %111 = vadd.xlane.f32.xlu1 %v88_v16  ;;  %109 = vadd.xlane.f32.xlu0 %v87_v17 }
  0x4a   :  { %115 = vadd.xlane.f32.xlu1 %v90_v20  ;;  %113 = vadd.xlane.f32.xlu0 %v89_v21 }
  0x4c   :  { %3171 = vmatpush3.bf16.xpose.msra.mxu0 %v3361_v28 }
  0x4d   :  { %3172 = vmatprep.subr.bf16.mxu0 %v3362_v35 }
  0x4e   :  { %119 = vadd.xlane.f32.xlu1 %v92_v24  ;;  %117 = vadd.xlane.f32.xlu0 %v91_v25 }
  0x52   :  { %123 = vadd.xlane.f32.xlu1 %v94_v29  ;;  %121 = vadd.xlane.f32.xlu0 %v93_v30 }
  0x54   :  { %3173 = vmatpush3.bf16.xpose.msra.mxu0 %v3362_v35 }
  0x56   :  { %127 = vadd.xlane.f32.xlu1 %v96_v33  ;;  %125 = vadd.xlane.f32.xlu0 %v95_v34 }
  0xc7   :  { %v102_v36 = vpop.xlane.xlu1 %101  ;;  %v98_v37 = vpop.xlane.xlu0 %97 }
  0xc8   :  { %v131_v38 = vmax.f32 %v102_v36, 1e-24  ;;  %v129_v39 = vmax.f32 %v98_v37, 1e-24 }
  0xca   :  { %3363 = vrsqrt.f32 %v131_v38 }
  0xcb   :  { %v104_v40 = vpop.xlane.xlu1 %103  ;;  %v100_v41 = vpop.xlane.xlu0 %99  ;;  %3365 = vrsqrt.f32 %v129_v39 }
  0xcc   :  { %v132_v42 = vmax.f32 %v104_v40, 1e-24  ;;  %v130_v43 = vmax.f32 %v100_v41, 1e-24 }
  0xce   :  { %3367 = vrsqrt.f32 %v132_v42 }
  0xcf   :  { %3369 = vrsqrt.f32 %v130_v43  ;;  %v108_v44 = vpop.xlane.xlu1 %107  ;;  %v106_v45 = vpop.xlane.xlu0 %105 }
  0xd0   :  { %v134_v46 = vmax.f32 %v108_v44, 1e-24  ;;  %v133_v47 = vmax.f32 %v106_v45, 1e-24 }
  0xd2   :  { %3371 = vrsqrt.f32 %v134_v46 }
  0xd3   :  { %3373 = vrsqrt.f32 %v133_v47  ;;  %v112_v48 = vpop.xlane.xlu1 %111  ;;  %v110_v49 = vpop.xlane.xlu0 %109 }
  0xd4   :  { %v136_v50 = vmax.f32 %v112_v48, 1e-24  ;;  %v135_v51 = vmax.f32 %v110_v49, 1e-24  ;;  %v3364_v52 = vpop.eup %3363 }
  0xd5   :  { %v3366_v53 = vpop.eup %3365  ;;  %v163_v60 = vmul.f32 %v3364_v52, %v3767_v0 }
  0xd6   :  { %3375 = vrsqrt.f32 %v136_v50  ;;  %v161_v62 = vmul.f32 %v3366_v53, %v3769_v1 }
  0xd7   :  { %3377 = vrsqrt.f32 %v135_v51  ;;  %v116_v54 = vpop.xlane.xlu1 %115  ;;  %v114_v55 = vpop.xlane.xlu0 %113 }
  0xd8   :  { %v3368_v56 = vpop.eup %3367  ;;  %v138_v57 = vmax.f32 %v116_v54, 1e-24  ;;  %v137_v58 = vmax.f32 %v114_v55, 1e-24 }
  0xd9   :  { %v3370_v59 = vpop.eup %3369  ;;  %v164_v61 = vmul.f32 %v3368_v56, %v3771_v2 }
  0xda   :  { %3379 = vrsqrt.f32 %v138_v57  ;;  %v162_v63 = vmul.f32 %v3370_v59, %v3777_v5 }
  0xdb   :  { %3381 = vrsqrt.f32 %v137_v58  ;;  %v120_v3 = vpop.xlane.xlu1 %119  ;;  %v118_v4 = vpop.xlane.xlu0 %117  ;;  %v3835_v6 = vpack.c.bf16 %v164_v61, %v163_v60 }
  0xdc   :  { %v3372_v7 = vpop.eup %3371  ;;  %v140_v11 = vmax.f32 %v120_v3, 1e-24  ;;  %v139_v12 = vmax.f32 %v118_v4, 1e-24  ;;  %v177_v13 = vpack.c.bf16 %v162_v63, %v161_v62 }
  0xdd   :  { %v3374_v14 = vpop.eup %3373  ;;  %v166_v16 = vmul.f32 %v3372_v7, %v3783_v8 }
  0xde   :  { %3383 = vrsqrt.f32 %v140_v11  ;;  %3174 = vmatprep.mubr.bf16.mxu0 %v177_v13  ;;  %3319 = vmatprep.subr.bf16.mxu1 %v177_v13  ;;  %v165_v0 = vmul.f32 %v3374_v14, %v3785_v9 }
  0xdf   :  { %3385 = vrsqrt.f32 %v139_v12  ;;  %3175 = vmatmul.mubr.bf16.vlgmr.msra.gmra.mrb[0].mxu0 %v3835_v6  ;;  %3321 = vmatpush3.bf16.msra.mxu1 %v177_v13  ;;  %v124_v1 = vpop.xlane.xlu1 %123  ;;  %v122_v2 = vpop.xlane.xlu0 %121 }
  0xe0   :  { %v3376_v5 = vpop.eup %3375  ;;  %3323 = vmatprep.subr.bf16.mxu1 %v3835_v6  ;;  %v142_v17 = vmax.f32 %v124_v1, 1e-24  ;;  %v141_v20 = vmax.f32 %v122_v2, 1e-24  ;;  %v3841_v21 = vpack.c.bf16 %v166_v16, %v165_v0 }
  0xe1   :  { %v3378_v24 = vpop.eup %3377  ;;  %v168_v8 = vmul.f32 %v3376_v5, %v3787_v10 }
  0xe2   :  { %3387 = vrsqrt.f32 %v142_v17  ;;  %3178 = vmatprep.mubr.bf16.mxu0 %v3841_v21  ;;  %v167_v9 = vmul.f32 %v3378_v24, %v3793_v15 }
  0xe3   :  { %3389 = vrsqrt.f32 %v141_v20  ;;  %v128_v25 = vpop.xlane.xlu1 %127  ;;  %v126_v28 = vpop.xlane.xlu0 %125 }
  0xe4   :  { %v3380_v29 = vpop.eup %3379  ;;  %v144_v30 = vmax.f32 %v128_v25, 1e-24  ;;  %v143_v33 = vmax.f32 %v126_v28, 1e-24  ;;  %v3846_v34 = vpack.c.bf16 %v168_v8, %v167_v9 }
  0xe5   :  { %v3382_v35 = vpop.eup %3381  ;;  %v170_v36 = vmul.f32 %v3380_v29, %v3799_v18 }
  0xe6   :  { %3391 = vrsqrt.f32 %v144_v30  ;;  %v169_v37 = vmul.f32 %v3382_v35, %v3801_v19 }
  0xe7   :  { %3393 = vrsqrt.f32 %v143_v33  ;;  %3179 = vmatmul.mubr.bf16.gmra.mrb[4].mxu0 %v3846_v34 }
  0xe8   :  { %v3384_v10 = vpop.eup %3383  ;;  %v181_v38 = vpack.c.bf16 %v170_v36, %v169_v37 }
  0xe9   :  { %v3386_v15 = vpop.eup %3385  ;;  %v172_v39 = vmul.f32 %v3384_v10, %v3807_v22 }
  0xea   :  { %3182 = vmatprep.mubr.bf16.mxu0 %v181_v38  ;;  %v171_v40 = vmul.f32 %v3386_v15, %v3809_v23  ;;  %3335 = vmatprep.subr.bf16.mxu0 %v181_v38 }
  0xeb   :  { %3337 = vmatpush3.bf16.msra.mxu0 %v181_v38 }
  0xec   :  { %v3388_v41 = vpop.eup %3387  ;;  %v3853_v42 = vpack.c.bf16 %v172_v39, %v171_v40 }
  0xed   :  { %v3390_v18 = vpop.eup %3389  ;;  %v174_v43 = vmul.f32 %v3388_v41, %v3815_v26 }
  0xee   :  { %v173_v19 = vmul.f32 %v3390_v18, %v3817_v27 }
  0xef   :  { %3183 = vmatmul.mubr.bf16.gmra.mrb[8].mxu0 %v3853_v42 }
  0xf0   :  { %v3392_v44 = vpop.eup %3391  ;;  %v3858_v45 = vpack.c.bf16 %v174_v43, %v173_v19 }
  0xf1   :  { %v3394_v46 = vpop.eup %3393  ;;  %v176_v22 = vmul.f32 %v3392_v44, %v3823_v31 }
  0xf2   :  { %3186 = vmatprep.mubr.bf16.mxu0 %v3858_v45  ;;  %v175_v23 = vmul.f32 %v3394_v46, %v3825_v32  ;;  %3343 = vmatprep.subr.bf16.mxu0 %v3858_v45 }
  0xf4   :  { %v3864_v47 = vpack.c.bf16 %v176_v22, %v175_v23 }
  0xf7   :  { %3187 = vmatmul.mubr.bf16.gmra.mrb[12].mxu0 %v3864_v47 }
 0x1b2   :  { %v3176_v26 = vpop.f32.mrb[0].mxu0 }
 0x1b3   :  { %v251_v27 = vpop.f32.mrb[1].mxu0  ;;  %v321_v48 = vsel %vm314_vm0, %v3176_v26, -inf }
 0x1b4   :  { %322 = vmax.xlane.f32.xlu0 %v321_v48  ;;  %v3177_v49 = vpop.f32.mrb[2].mxu0  ;;  %v315_v51 = vsel %vm314_vm0, %v251_v27, -inf }
 0x1b5   :  { %v254_v50 = vpop.f32.mrb[3].mxu0  ;;  %v324_v31 = vsel %vm314_vm0, %v3177_v49, -inf }
 0x1b6   :  { %325 = vmax.xlane.f32.xlu1 %v324_v31  ;;  %v318_v32 = vsel %vm314_vm0, %v254_v50, -inf }
 0x1b8   :  { %316 = vmax.xlane.f32.xlu0 %v315_v51 }
 0x1ba   :  { %319 = vmax.xlane.f32.xlu1 %v318_v32  ;;  %v3180_v52 = vpop.f32.mrb[4].mxu0 }
 0x1bb   :  { %v3871_v53 = vpop.f32.mrb[5].mxu0  ;;  %v333_v54 = vsel %vm314_vm0, %v3180_v52, -inf }
 0x1bc   :  { %334 = vmax.xlane.f32.xlu0 %v333_v54  ;;  %v3181_v55 = vpop.f32.mrb[6].mxu0  ;;  %v327_v57 = vsel %vm314_vm0, %v3871_v53, -inf }
 0x1bd   :  { %v336_v56 = vsel %vm314_vm0, %v3181_v55, -inf  ;;  %v270_v58 = vpop.f32.mrb[7].mxu0 }
 0x1be   :  { %337 = vmax.xlane.f32.xlu1 %v336_v56  ;;  %v330_v59 = vsel %vm314_vm0, %v270_v58, -inf }
 0x1c0   :  { %328 = vmax.xlane.f32.xlu0 %v327_v57 }
 0x1c2   :  { %331 = vmax.xlane.f32.xlu1 %v330_v59  ;;  %v3878_v60 = vpop.f32.mrb[8].mxu0 }
 0x1c3   :  { %v3880_v61 = vpop.f32.mrb[9].mxu0  ;;  %v345_v62 = vsel %vm314_vm0, %v3878_v60, -inf }
 0x1c4   :  { %v339_v63 = vsel %vm314_vm0, %v3880_v61, -inf  ;;  %v3886_v3 = vpop.f32.mrb[10].mxu0 }
 0x1c5   :  { %340 = vmax.xlane.f32.xlu0 %v339_v63  ;;  %v3888_v4 = vpop.f32.mrb[11].mxu0  ;;  %v348_v11 = vsel %vm314_vm0, %v3886_v3, -inf }
 0x1c6   :  { %346 = vmax.xlane.f32.xlu1 %v345_v62  ;;  %v342_v7 = vsel %vm314_vm0, %v3888_v4, -inf }
 0x1c9   :  { %343 = vmax.xlane.f32.xlu0 %v342_v7 }
 0x1ca   :  { %349 = vmax.xlane.f32.xlu1 %v348_v11  ;;  %v3894_v12 = vpop.f32.mrb[12].mxu0 }
 0x1cb   :  { %v3896_v13 = vpop.f32.mrb[13].mxu0  ;;  %v357_v14 = vsel %vm314_vm0, %v3894_v12, -inf }
 0x1cc   :  { %v351_v16 = vsel %vm314_vm0, %v3896_v13, -inf  ;;  %v3902_v0 = vpop.f32.mrb[14].mxu0 }
 0x1cd   :  { %352 = vmax.xlane.f32.xlu0 %v351_v16  ;;  %v3904_v1 = vpop.f32.mrb[15].mxu0  ;;  %v360_v5 = vsel %vm314_vm0, %v3902_v0, -inf }
 0x1ce   :  { %358 = vmax.xlane.f32.xlu1 %v357_v14  ;;  %v354_v2 = vsel %vm314_vm0, %v3904_v1, -inf }
 0x1d1   :  { %355 = vmax.xlane.f32.xlu0 %v354_v2 }
 0x1d2   :  { %361 = vmax.xlane.f32.xlu1 %v360_v5 }
 0x241   :  { %v323_v17 = vpop.xlane.xlu0 %322 }
 0x242   :  { %v365_v20 = vsub.f32 %v3176_v26, %v323_v17 }
 0x243   :  { %v326_v24 = vpop.xlane.xlu1 %325 }
 0x244   :  { %v383_v8 = vmul.f32 1.442695, %v365_v20  ;;  %v366_v9 = vsub.f32 %v3177_v49, %v326_v24 }
 0x245   :  { %v317_v25 = vpop.xlane.xlu0 %316 }
 0x246   :  { %3395 = vpow2.f32 %v383_v8  ;;  %v385_v28 = vmul.f32 1.442695, %v366_v9  ;;  %v363_v29 = vsub.f32 %v251_v27, %v317_v25 }
 0x247   :  { %v320_v30 = vpop.xlane.xlu1 %319 }
 0x248   :  { %3397 = vpow2.f32 %v385_v28  ;;  %v379_v33 = vmul.f32 1.442695, %v363_v29  ;;  %v364_v35 = vsub.f32 %v254_v50, %v320_v30 }
 0x249   :  { %v335_v36 = vpop.xlane.xlu0 %334 }
 0x24a   :  { %3399 = vpow2.f32 %v379_v33  ;;  %v381_v37 = vmul.f32 1.442695, %v364_v35  ;;  %v369_v10 = vsub.f32 %v3180_v52, %v335_v36 }
 0x24b   :  { %v338_v38 = vpop.xlane.xlu1 %337 }
 0x24c   :  { %3401 = vpow2.f32 %v381_v37  ;;  %v391_v15 = vmul.f32 1.442695, %v369_v10  ;;  %v370_v39 = vsub.f32 %v3181_v55, %v338_v38 }
 0x24d   :  { %v329_v40 = vpop.xlane.xlu0 %328 }
 0x24e   :  { %3403 = vpow2.f32 %v391_v15  ;;  %v393_v41 = vmul.f32 1.442695, %v370_v39  ;;  %v367_v18 = vsub.f32 %v3871_v53, %v329_v40 }
 0x24f   :  { %v332_v43 = vpop.xlane.xlu1 %331 }
 0x250   :  { %v3911_v19 = vpop.eup %3395  ;;  %3405 = vpow2.f32 %v393_v41  ;;  %v387_v44 = vmul.f32 1.442695, %v367_v18  ;;  %v368_v46 = vsub.f32 %v270_v58, %v332_v43 }
 0x251   :  { %v417_v22 = vsel %vm314_vm0, %v3911_v19, 0.0 }
 0x252   :  { %v3915_v23 = vpop.eup %3397  ;;  %3407 = vpow2.f32 %v387_v44  ;;  %v389_v26 = vmul.f32 1.442695, %v368_v46  ;;  %418 = vadd.xlane.f32.xlu0 %v417_v22  ;;  %v341_v27 = vpop.xlane.xlu0 %340 }
 0x253   :  { %v371_v48 = vsub.f32 %v3880_v61, %v341_v27  ;;  %v347_v49 = vpop.xlane.xlu1 %346  ;;  %v420_v50 = vsel %vm314_vm0, %v3915_v23, 0.0 }
 0x254   :  { %v3920_v31 = vpop.eup %3399  ;;  %3409 = vpow2.f32 %v389_v26  ;;  %v373_v51 = vsub.f32 %v3878_v60, %v347_v49  ;;  %421 = vadd.xlane.f32.xlu1 %v420_v50 }
 0x255   :  { %v395_v32 = vmul.f32 1.442695, %v371_v48  ;;  %v411_v52 = vsel %vm314_vm0, %v3920_v31, 0.0 }
 0x256   :  { %v3925_v53 = vpop.eup %3401  ;;  %v399_v54 = vmul.f32 1.442695, %v373_v51  ;;  %412 = vadd.xlane.f32.xlu0 %v411_v52  ;;  %v344_v55 = vpop.xlane.xlu0 %343 }
 0x257   :  { %3411 = vpow2.f32 %v395_v32  ;;  %v372_v56 = vsub.f32 %v3888_v4, %v344_v55  ;;  %v350_v57 = vpop.xlane.xlu1 %349  ;;  %v414_v58 = vsel %vm314_vm0, %v3925_v53, 0.0 }
 0x258   :  { %v3930_v59 = vpop.eup %3403  ;;  %3413 = vpow2.f32 %v399_v54  ;;  %v374_v60 = vsub.f32 %v3886_v3, %v350_v57  ;;  %415 = vadd.xlane.f32.xlu1 %v414_v58 }
 0x259   :  { %v397_v61 = vmul.f32 1.442695, %v372_v56  ;;  %v429_v62 = vsel %vm314_vm0, %v3930_v59, 0.0 }
 0x25a   :  { %v3935_v63 = vpop.eup %3405  ;;  %v401_v7 = vmul.f32 1.442695, %v374_v60  ;;  %430 = vadd.xlane.f32.xlu0 %v429_v62  ;;  %v353_v11 = vpop.xlane.xlu0 %352 }
 0x25b   :  { %3415 = vpow2.f32 %v397_v61  ;;  %v375_v4 = vsub.f32 %v3896_v13, %v353_v11  ;;  %v359_v14 = vpop.xlane.xlu1 %358  ;;  %v432_v16 = vsel %vm314_vm0, %v3935_v63, 0.0 }
 0x25c   :  { %v3940_v2 = vpop.eup %3407  ;;  %3417 = vpow2.f32 %v401_v7  ;;  %v377_v3 = vsub.f32 %v3894_v12, %v359_v14  ;;  %433 = vadd.xlane.f32.xlu1 %v432_v16 }
 0x25d   :  { %v403_v5 = vmul.f32 1.442695, %v375_v4  ;;  %v423_v17 = vsel %vm314_vm0, %v3940_v2, 0.0 }
 0x25e   :  { %v3945_v20 = vpop.eup %3409  ;;  %v407_v24 = vmul.f32 1.442695, %v377_v3  ;;  %424 = vadd.xlane.f32.xlu0 %v423_v17  ;;  %v356_v8 = vpop.xlane.xlu0 %355 }
 0x25f   :  { %3419 = vpow2.f32 %v403_v5  ;;  %v376_v13 = vsub.f32 %v3904_v1, %v356_v8  ;;  %v362_v9 = vpop.xlane.xlu1 %361  ;;  %v426_v25 = vsel %vm314_vm0, %v3945_v20, 0.0 }
 0x260   :  { %3421 = vpow2.f32 %v407_v24  ;;  %v378_v12 = vsub.f32 %v3902_v0, %v362_v9  ;;  %427 = vadd.xlane.f32.xlu1 %v426_v25 }
 0x261   :  { %v3951_v28 = vpop.eup %3411  ;;  %v405_v29 = vmul.f32 1.442695, %v376_v13 }
 0x262   :  { %v3953_v30 = vpop.eup %3413  ;;  %v409_v33 = vmul.f32 1.442695, %v378_v12  ;;  %v435_v35 = vsel %vm314_vm0, %v3951_v28, 0.0 }
 0x263   :  { %3423 = vpow2.f32 %v405_v29  ;;  %436 = vadd.xlane.f32.xlu0 %v435_v35  ;;  %v441_v1 = vsel %vm314_vm0, %v3953_v30, 0.0 }
 0x264   :  { %3425 = vpow2.f32 %v409_v33  ;;  %442 = vadd.xlane.f32.xlu1 %v441_v1 }
 0x265   :  { %v3959_v36 = vpop.eup %3415 }
 0x266   :  { %v3961_v0 = vpop.eup %3417  ;;  %v438_v37 = vsel %vm314_vm0, %v3959_v36, 0.0 }
 0x267   :  { %439 = vadd.xlane.f32.xlu0 %v438_v37  ;;  %v444_v10 = vsel %vm314_vm0, %v3961_v0, 0.0 }
 0x268   :  { %445 = vadd.xlane.f32.xlu1 %v444_v10 }
 0x269   :  { %v3967_v38 = vpop.eup %3419 }
 0x26a   :  { %v3969_v15 = vpop.eup %3421  ;;  %v447_v39 = vsel %vm314_vm0, %v3967_v38, 0.0 }
 0x26b   :  { %448 = vadd.xlane.f32.xlu0 %v447_v39  ;;  %v453_v40 = vsel %vm314_vm0, %v3969_v15, 0.0 }
 0x26c   :  { %454 = vadd.xlane.f32.xlu1 %v453_v40 }
 0x26d   :  { %v3975_v41 = vpop.eup %3423 }
 0x26e   :  { %v3977_v18 = vpop.eup %3425  ;;  %v450_v43 = vsel %vm314_vm0, %v3975_v41, 0.0 }
 0x26f   :  { %451 = vadd.xlane.f32.xlu0 %v450_v43  ;;  %v456_v44 = vsel %vm314_vm0, %v3977_v18, 0.0 }
 0x270   :  { %457 = vadd.xlane.f32.xlu1 %v456_v44 }
 0x2df   :  { %v419_v46 = vpop.xlane.xlu0 %418 }
 0x2e0   :  { %3427 = vrcp.f32 %v419_v46 }
 0x2e1   :  { %v422_v22 = vpop.xlane.xlu1 %421 }
 0x2e2   :  { %3429 = vrcp.f32 %v422_v22 }
 0x2e3   :  { %v413_v26 = vpop.xlane.xlu0 %412 }
 0x2e4   :  { %3431 = vrcp.f32 %v413_v26 }
 0x2e5   :  { %v416_v27 = vpop.xlane.xlu1 %415 }
 0x2e6   :  { %3433 = vrcp.f32 %v416_v27 }
 0x2e7   :  { %v431_v48 = vpop.xlane.xlu0 %430 }
 0x2e9   :  { %v434_v49 = vpop.xlane.xlu1 %433 }
 0x2ea   :  { %v3428_v50 = vpop.eup %3427 }
 0x2eb   :  { %v425_v51 = vpop.xlane.xlu0 %424  ;;  %v477_v32 = vmul.f32 %v3428_v50, %v3911_v19 }
 0x2ec   :  { %v3430_v52 = vpop.eup %3429  ;;  %3435 = vrcp.f32 %v425_v51 }
 0x2ed   :  { %v428_v54 = vpop.xlane.xlu1 %427  ;;  %523 = vxpose.xlu1.b32.start [1/2] (short) (narrow) %v477_v32, 64  ;;  %v478_v55 = vmul.f32 %v3430_v52, %v3915_v23  ;;  %v1789_v58 = vsel %vm314_vm0, %v477_v32, 0.0 }
 0x2ee   :  { %v3432_v56 = vpop.eup %3431  ;;  %3437 = vrcp.f32 %v428_v54 }
 0x2ef   :  { %v3986_v57 = vmul.f32 %v3432_v56, %v3920_v31  ;;  %v1790_v60 = vsel %vm314_vm0, %v478_v55, 0.0  ;;  %3439 = vrcp.f32 %v431_v48 }
 0x2f0   :  { %v3434_v61 = vpop.eup %3433  ;;  %v1791_v62 = vadd.f32 %v1790_v60, %v1789_v58  ;;  %3441 = vrcp.f32 %v434_v49 }
 0x2f1   :  { %v3991_v7 = vmul.f32 %v3434_v61, %v3925_v53  ;;  %524 = vxpose.xlu1.b32.end [2/2] (short) (narrow) %v478_v55, 64  ;;  %v1780_v11 = vsel %vm314_vm0, %v3986_v57, 0.0  ;;  %v443_v54 = vpop.xlane.xlu1 %442  ;;  %v437_v55 = vpop.xlane.xlu0 %436 }
 0x2f2   :  { %v1792_v19 = vrot.slane %v1791_v62, 4  ;;  %3443 = vrcp.f32 %v443_v54 }
 0x2f3   :  { %v1781_v23 = vsel %vm314_vm0, %v3991_v7, 0.0  ;;  %3445 = vrcp.f32 %v437_v55 }
 0x2f4   :  { %v1782_v4 = vadd.f32 %v1781_v23, %v1780_v11  ;;  %v1793_v31 = vadd.f32 %v1792_v19, %v1791_v62 }
 0x2f5   :  { %v446_v56 = vpop.xlane.xlu1 %445  ;;  %v440_v58 = vpop.xlane.xlu0 %439 }
 0x2f6   :  { %v1794_v14 = vrot.slane %v1793_v31, 2  ;;  %v3436_v16 = vpop.eup %3435  ;;  %v1783_v5 = vrot.slane %v1782_v4, 4  ;;  %3447 = vrcp.f32 %v446_v56 }
 0x2f7   :  { %v479_v8 = vmul.f32 %v3436_v16, %v3940_v2  ;;  %3449 = vrcp.f32 %v440_v58 }
 0x2f8   :  { %v3438_v3 = vpop.eup %3437  ;;  %v1795_v17 = vadd.f32 %v1794_v14, %v1793_v31  ;;  %v1784_v13 = vadd.f32 %v1783_v5, %v1782_v4 }
 0x2f9   :  { %v3998_v24 = vmul.f32 %v3438_v3, %v3945_v20  ;;  %v1798_v12 = vsel %vm314_vm0, %v479_v8, 0.0  ;;  %v3440_v20 = vpop.eup %3439  ;;  %v4022_v60 = vpop.xlane.xlu1 %454 }
 0x2fa   :  { %v1796_v53 = vrot.slane %v1795_v17, 1  ;;  %v1785_v29 = vrot.slane %v1784_v13, 2  ;;  %v3442_v37 = vpop.eup %3441  ;;  %v481_v2 = vmul.f32 %v3440_v20, %v3930_v59  ;;  %v449_v61 = vpop.xlane.xlu0 %448 }
 0x2fb   :  { %v1799_v25 = vsel %vm314_vm0, %v3998_v24, 0.0  ;;  %v482_v40 = vmul.f32 %v3442_v37, %v3935_v63  ;;  %3451 = vrcp.f32 %v449_v61 }
 0x2fc   :  { %v1797_v9 = vadd.f32 %v1796_v53, %v1795_v17  ;;  %v1800_v33 = vadd.f32 %v1799_v25, %v1798_v12  ;;  %v1786_v35 = vadd.f32 %v1785_v29, %v1784_v13  ;;  %v1807_v22 = vsel %vm314_vm0, %v481_v2, 0.0  ;;  %v3444_v31 = vpop.eup %3443 }
 0x2fd   :  { %v1808_v46 = vsel %vm314_vm0, %v482_v40, 0.0  ;;  %v4024_v62 = vpop.xlane.xlu1 %457  ;;  %v3446_v16 = vpop.eup %3445  ;;  %v485_v5 = vmul.f32 %v3444_v31, %v3953_v30 }
 0x2fe   :  { %1884 = vbcast.lane.b32.xlu0 %v1797_v9, 256  ;;  %v1801_v1 = vrot.slane %v1800_v33, 4  ;;  %v1787_v10 = vrot.slane %v1786_v35, 1  ;;  %v1809_v27 = vadd.f32 %v1808_v46, %v1807_v22  ;;  %v452_v19 = vpop.xlane.xlu0 %451 }
 0x2ff   :  { %3453 = vrcp.f32 %v452_v19 }
 0x300   :  { %v1802_v39 = vadd.f32 %v1801_v1, %v1800_v33  ;;  %v1788_v43 = vadd.f32 %v1787_v10, %v1786_v35  ;;  %v1810_v49 = vrot.slane %v1809_v27, 4  ;;  %v3448_v17 = vpop.eup %3447  ;;  %3455 = vrcp.f32 %v4024_v62 }
 0x301   :  { %v3450_v53 = vpop.eup %3449  ;;  %v486_v13 = vmul.f32 %v3448_v17, %v3961_v0  ;;  %3457 = vrcp.f32 %v4022_v60 }
 0x302   :  { %1892 = vbcast.lane.b32.xlu0 %v1797_v9, 272  ;;  %v1803_v44 = vrot.slane %v1802_v39, 2  ;;  %v1811_v59 = vadd.f32 %v1810_v49, %v1809_v27 }
 0x304   :  { %v1804_v26 = vadd.f32 %v1803_v44, %v1802_v39  ;;  %v1812_v63 = vrot.slane %v1811_v59, 2 }
 0x305   :  { %v3452_v0 = vpop.eup %3451 }
 0x306   :  { %1900 = vbcast.lane.b32.xlu0 %v1797_v9, 288  ;;  %v1805_v48 = vrot.slane %v1804_v26, 1  ;;  %v1813_v51 = vadd.f32 %v1812_v63, %v1811_v59  ;;  %v4066_v20 = vmul.f32 %v3452_v0, %v3967_v38  ;;  %v1826_v59 = vsel %vm314_vm0, %v486_v13, 0.0 }
 0x308   :  { %v4008_v50 = vadd.f32 %v1805_v48, %v1804_v26  ;;  %v1814_v32 = vrot.slane %v1813_v51, 1 }
 0x309   :  { %v3454_v37 = vpop.eup %3453 }
 0x30a   :  { %1908 = vbcast.lane.b32.xlu0 %v1797_v9, 304  ;;  %587 = vxpose.xlu1.b32.start [1/2] (short) (narrow) %v481_v2, 64  ;;  %v4014_v52 = vadd.f32 %v1814_v32, %v1813_v51  ;;  %v4072_v39 = vmul.f32 %v3454_v37, %v3975_v41  ;;  %v1825_v32 = vsel %vm314_vm0, %v485_v5, 0.0 }
 0x30b   :  { %v1827_v54 = vadd.f32 %v1826_v59, %v1825_v32 }
 0x30d   :  { %v1828_v58 = vrot.slane %v1827_v54, 4 }
 0x30e   :  { %1853 = vbcast.lane.b32.xlu0 %v1788_v43, 256  ;;  %588 = vxpose.xlu1.b32.end [2/2] (short) (narrow) %v482_v40, 64 }
 0x30f   :  { %v1829_v19 = vadd.f32 %v1828_v58, %v1827_v54  ;;  %v3456_v54 = vpop.eup %3455 }
 0x312   :  { %1869 = vbcast.lane.b32.xlu0 %v1788_v43, 288 }
 0x316   :  { %1877 = vbcast.lane.b32.xlu0 %v1788_v43, 304 }
 0x31a   :  { %1915 = vbcast.lane.b32.xlu0 %v4008_v50, 256 }
 0x31e   :  { %1923 = vbcast.lane.b32.xlu0 %v4008_v50, 272 }
 0x322   :  { %1931 = vbcast.lane.b32.xlu0 %v4008_v50, 288 }
 0x326   :  { %1939 = vbcast.lane.b32.xlu0 %v4008_v50, 304 }
 0x32a   :  { %1946 = vbcast.lane.b32.xlu0 %v4014_v52, 256 }
 0x32e   :  { %1954 = vbcast.lane.b32.xlu0 %v4014_v52, 272 }
 0x332   :  { %1962 = vbcast.lane.b32.xlu0 %v4014_v52, 288 }
 0x336   :  { %1970 = vbcast.lane.b32.xlu0 %v4014_v52, 304 }
 0x344   :  { %1888 = vbcast.lane.b32.xlu1 %v1797_v9, 264 }
 0x348   :  { %1896 = vbcast.lane.b32.xlu1 %v1797_v9, 280 }
 0x34c   :  { %1904 = vbcast.lane.b32.xlu1 %v1797_v9, 296 }
 0x350   :  { %1912 = vbcast.lane.b32.xlu1 %v1797_v9, 312  ;;  %v484_v9 = vmul.f32 %v3450_v53, %v3959_v36  ;;  %v1830_v53 = vrot.slane %v1829_v19, 2 }
 0x352   :  { %v1817_v31 = vsel %vm314_vm0, %v484_v9, 0.0  ;;  %v1831_v37 = vadd.f32 %v1830_v53, %v1829_v19 }
 0x354   :  { %1857 = vbcast.lane.b32.xlu1 %v1788_v43, 264  ;;  %491 = vxpose.xlu0.b32.start [1/2] (short) (narrow) %v3986_v57, 64 }
 0x358   :  { %1861 = vbcast.lane.b32.xlu1 %v1788_v43, 272  ;;  %492 = vxpose.xlu0.b32.end [2/2] (short) (narrow) %v3991_v7, 64 }
 0x35c   :  { %1865 = vbcast.lane.b32.xlu1 %v1788_v43, 280 }
 0x360   :  { %1873 = vbcast.lane.b32.xlu1 %v1788_v43, 296 }
 0x364   :  { %1881 = vbcast.lane.b32.xlu1 %v1788_v43, 312 }
 0x36d   :  { %v4027_v57 = vpop.trf.xlu1 }
 0x370   :  { %v4029_v11 = vpop.permute.xlu0 %1884 }
 0x371   :  { %555 = vxpose.xlu0.b32.start [1/2] (short) (narrow) %v479_v8, 64  ;;  %v4031_v7 = vpop.trf.xlu1 }
 0x374   :  { %v4033_v23 = vpop.permute.xlu0 %1892 }
 0x375   :  { %556 = vxpose.xlu0.b32.end [2/2] (short) (narrow) %v3998_v24, 64  ;;  %v4035_v4 = vpop.trf.xlu1  ;;  %v483_v24 = vmul.f32 %v3446_v16, %v3951_v28 }
 0x377   :  { %v1816_v17 = vsel %vm314_vm0, %v483_v24, 0.0 }
 0x378   :  { %v4037_v14 = vpop.permute.xlu0 %1900 }
 0x379   :  { %v4039_v3 = vpop.trf.xlu1 }
 0x37c   :  { %v4043_v8 = vpop.permute.xlu0 %1908 }
 0x37d   :  { %v4047_v25 = vpop.trf.xlu1 }
 0x380   :  { %v4049_v12 = vpop.permute.xlu0 %1853 }
 0x381   :  { %v4051_v29 = vpop.trf.xlu1 }
 0x384   :  { %v4053_v30 = vpop.permute.xlu0 %1869 }
 0x385   :  { %v4055_v28 = vpop.trf.xlu1 }
 0x388   :  { %v4057_v33 = vpop.permute.xlu0 %1877 }
 0x389   :  { %v4059_v35 = vpop.trf.xlu1 }
 0x38c   :  { %v4061_v36 = vpop.permute.xlu0 %1915 }
 0x38d   :  { %651 = vxpose.xlu1.b32.start [1/2] (short) (narrow) %v485_v5, 64  ;;  %v4063_v1 = vpop.trf.xlu1 }
 0x38e   :  { %619 = vxpose.xlu0.b32.start [1/2] (short) (narrow) %v483_v24, 64 }
 0x390   :  { %v4069_v10 = vpop.permute.xlu0 %1923 }
 0x391   :  { %652 = vxpose.xlu1.b32.end [2/2] (short) (narrow) %v486_v13, 64  ;;  %5528 = vst [vmem:[#allocation12_spill] sm:$0xff] %v4069_v10  ;;  %v4074_v2 = vpop.trf.xlu1  ;;  %v1818_v13 = vadd.f32 %v1817_v31, %v1816_v17 }
 0x392   :  { %620 = vxpose.xlu0.b32.end [2/2] (short) (narrow) %v484_v9, 64 }
 0x393   :  { %v1819_v9 = vrot.slane %v1818_v13, 4 }
 0x394   :  { %v4077_v40 = vpop.permute.xlu0 %1931 }
 0x395   :  { %5529 = vst [vmem:[#allocation13_spill] sm:$0xff] %v4077_v40  ;;  %v4079_v43 = vpop.trf.xlu1  ;;  %v1820_v24 = vadd.f32 %v1819_v9, %v1818_v13 }
 0x397   :  { %v1821_v58 = vrot.slane %v1820_v24, 2 }
 0x398   :  { %v4081_v44 = vpop.permute.xlu0 %1939 }
 0x399   :  { %5530 = vst [vmem:[#allocation14_spill] sm:$0xff] %v4081_v44  ;;  %v4083_v38 = vpop.trf.xlu1  ;;  %v1822_v17 = vadd.f32 %v1821_v58, %v1820_v24 }
 0x39c   :  { %v4085_v46 = vpop.permute.xlu0 %1946 }
 0x39d   :  { %5531 = vst [vmem:[#allocation15_spill] sm:$0xff] %v4085_v46  ;;  %v4087_v22 = vpop.trf.xlu1 }
 0x3a0   :  { %v4089_v26 = vpop.permute.xlu0 %1954 }
 0x3a1   :  { %v4091_v41 = vpop.trf.xlu1 }
 0x3a4   :  { %v4094_v27 = vpop.permute.xlu0 %1962 }
 0x3a5   :  { %5532 = vst [vmem:[#allocation16_spill] sm:$0xff] %v4094_v27  ;;  %v4097_v48 = vpop.trf.xlu1 }
 0x3a8   :  { %v4100_v49 = vpop.permute.xlu0 %1970 }
 0x3a9   :  { %5533 = vst [vmem:[#allocation17_spill] sm:$0xff] %v4100_v49  ;;  %v4103_v63 = vpop.trf.xlu1 }
 0x3ab   :  { %683 = vxpose.xlu0.b32.start [1/2] (short) (narrow) %v4066_v20, 64 }
 0x3af   :  { %684 = vxpose.xlu0.b32.end [2/2] (short) (narrow) %v4072_v39, 64 }
 0x3b6   :  { %v4107_v56 = vpop.permute.xlu1 %1888 }
 0x3ba   :  { %v4114_v16 = vpop.permute.xlu1 %1896 }
 0x3be   :  { %v4120_v0 = vpop.permute.xlu1 %1904 }
 0x3c2   :  { %v4124_v32 = vpop.permute.xlu1 %1912 }
 0x3c6   :  { %v4131_v31 = vpop.permute.xlu1 %1857 }
 0x3c7   :  { %1919 = vbcast.lane.b32.xlu1 %v4008_v50, 264 }
 0x3cb   :  { %1927 = vbcast.lane.b32.xlu1 %v4008_v50, 280 }
 0x3cf   :  { %1935 = vbcast.lane.b32.xlu1 %v4008_v50, 296 }
 0x3d4   :  { %v507_v51 = vpop.trf.xlu0 }
 0x3d5   :  { %3194 = vmatprep.mubr.msk.f32.mxu1 %vm747_vm1, %v507_v51  ;;  %v1832_v51 = vrot.slane %v1831_v37, 1 }
 0x3d7   :  { %v4127_v60 = vadd.f32 %v1832_v51, %v1831_v37  ;;  %v4145_v37 = vpop.permute.xlu1 %1861  ;;  %v1834_v51 = vsel %vm314_vm0, %v4066_v20, 0.0 }
 0x3d8   :  { %v508_v55 = vpop.trf.xlu0 }
 0x3d9   :  { %3195 = vmatmul.mubr.msk.f32.vlgmr.msra.gmra.mrb[0].mxu1 %vm747_vm1, %v508_v55  ;;  %v3458_v55 = vpop.eup %3457 }
 0x3da   :  { %3325 = vmatpush3.bf16.msra.mxu1 %v3835_v6 }
 0x3db   :  { %3327 = vmatprep.subr.bf16.mxu1 %v3841_v21  ;;  %v4156_v9 = vpop.permute.xlu1 %1865 }
 0x3dc   :  { %v509_v61 = vpop.trf.xlu0 }
 0x3dd   :  { %3197 = vmatprep.mubr.msk.f32.mxu1 %vm747_vm1, %v509_v61  ;;  %v490_v61 = vmul.f32 %v3456_v54, %v3977_v18 }
 0x3df   :  { %v1844_v53 = vsel %vm314_vm0, %v490_v61, 0.0 }
 0x3e0   :  { %v510_v5 = vpop.trf.xlu0 }
 0x3e1   :  { %3198 = vmatmul.mubr.msk.f32.gmra.mrb[2].mxu1 %vm747_vm1, %v510_v5  ;;  %v489_v5 = vmul.f32 %v3458_v55, %v3969_v15 }
 0x3e3   :  { %v1843_v18 = vsel %vm314_vm0, %v489_v5, 0.0 }
 0x3e4   :  { %v511_v6 = vpop.trf.xlu0  ;;  %v1845_v15 = vadd.f32 %v1844_v53, %v1843_v18 }
 0x3e5   :  { %3200 = vmatprep.mubr.msk.f32.mxu1 %vm747_vm1, %v511_v6  ;;  %v1823_v6 = vrot.slane %v1822_v17, 1 }
 0x3e8   :  { %v512_v59 = vpop.trf.xlu0 }
 0x3e9   :  { %3201 = vmatmul.mubr.msk.f32.gmra.mrb[4].mxu1 %vm747_vm1, %v512_v59 }
 0x3ec   :  { %v513_v62 = vpop.trf.xlu0 }
 0x3ed   :  { %3203 = vmatprep.mubr.msk.f32.mxu1 %vm747_vm1, %v513_v62 }
 0x3f0   :  { %2008 = vbcast.lane.b32.xlu0 %v4127_v60, 256  ;;  %v514_v19 = vpop.trf.xlu0 }
 0x3f1   :  { %3204 = vmatmul.mubr.msk.f32.gmra.mrb[6].mxu1 %vm747_vm1, %v514_v19 }
 0x3f2   :  { %3210 = vmatprep.mubr.msk.f32.mxu1 %vm747_vm1, %v4027_v57 }
 0x3f4   :  { %2016 = vbcast.lane.b32.xlu0 %v4127_v60, 272  ;;  %v571_v13 = vpop.trf.xlu0 }
 0x3f5   :  { %3211 = vmatmul.mubr.msk.f32.vlgmr.msra.gmra.mrb[8].mxu1 %vm747_vm1, %v4031_v7  ;;  %v4151_v7 = vadd.f32 %v1823_v6, %v1822_v17 }
 0x3f6   :  { %3329 = vmatpush3.bf16.msra.mxu1 %v3841_v21  ;;  %3213 = vmatprep.mubr.msk.f32.mxu1 %vm747_vm1, %v4035_v4  ;;  %v1846_v21 = vrot.slane %v1845_v15, 4 }
 0x3f7   :  { %3331 = vmatprep.subr.bf16.mxu1 %v3846_v34 }
 0x3f8   :  { %715 = vxpose.xlu1.b32.start [1/2] (short) (narrow) %v489_v5, 64  ;;  %2024 = vbcast.lane.b32.xlu0 %v4127_v60, 288  ;;  %v572_v57 = vpop.trf.xlu0  ;;  %v1847_v59 = vadd.f32 %v1846_v21, %v1845_v15 }
 0x3f9   :  { %3214 = vmatmul.mubr.msk.f32.gmra.mrb[10].mxu1 %vm747_vm1, %v4039_v3  ;;  %v1835_v3 = vsel %vm314_vm0, %v4072_v39, 0.0 }
 0x3fa   :  { %3216 = vmatprep.mubr.msk.f32.mxu1 %vm747_vm1, %v4047_v25  ;;  %v1836_v24 = vadd.f32 %v1835_v3, %v1834_v51  ;;  %v1848_v54 = vrot.slane %v1847_v59, 2 }
 0x3fc   :  { %716 = vxpose.xlu1.b32.end [2/2] (short) (narrow) %v490_v61, 64  ;;  %1977 = vbcast.lane.b32.xlu0 %v4151_v7, 256  ;;  %v573_v4 = vpop.trf.xlu0  ;;  %v1837_v39 = vrot.slane %v1836_v24, 4  ;;  %v1849_v62 = vadd.f32 %v1848_v54, %v1847_v59 }
 0x3fd   :  { %3217 = vmatmul.mubr.msk.f32.gmra.mrb[12].mxu1 %vm747_vm1, %v4051_v29  ;;  %v4170_v29 = vpop.permute.xlu1 %1873 }
 0x3fe   :  { %3219 = vmatprep.mubr.msk.f32.mxu1 %vm747_vm1, %v4055_v28  ;;  %v1838_v55 = vadd.f32 %v1837_v39, %v1836_v24  ;;  %v1850_v58 = vrot.slane %v1849_v62, 1 }
 0x400   :  { %1985 = vbcast.lane.b32.xlu0 %v4151_v7, 272  ;;  %v574_v25 = vpop.trf.xlu0  ;;  %v1839_v19 = vrot.slane %v1838_v55, 2  ;;  %v4184_v5 = vadd.f32 %v1850_v58, %v1849_v62 }
 0x401   :  { %3220 = vmatmul.mubr.msk.f32.gmra.mrb[14].mxu1 %vm747_vm1, %v4059_v35  ;;  %v4178_v20 = vpop.permute.xlu1 %1881 }
 0x402   :  { %3226 = vmatprep.mubr.msk.f32.mxu1 %vm747_vm1, %v571_v13  ;;  %v1840_v13 = vadd.f32 %v1839_v19, %v1838_v55 }
 0x404   :  { %1993 = vbcast.lane.b32.xlu0 %v4151_v7, 288  ;;  %v575_v28 = vpop.trf.xlu0  ;;  %v1841_v15 = vrot.slane %v1840_v13, 1 }
 0x405   :  { %3227 = vmatmul.mubr.msk.f32.vlgmr.msra.gmra.mrb[16].mxu1 %vm747_vm1, %v572_v57 }
 0x406   :  { %3333 = vmatpush3.bf16.msra.mxu1 %v3846_v34  ;;  %3229 = vmatprep.mubr.msk.f32.mxu1 %vm747_vm1, %v573_v4  ;;  %v4203_v57 = vadd.f32 %v1841_v15, %v1840_v13 }
 0x407   :  { %3339 = vmatprep.subr.bf16.mxu1 %v3853_v42 }
 0x408   :  { %2001 = vbcast.lane.b32.xlu0 %v4151_v7, 304  ;;  %v576_v35 = vpop.trf.xlu0 }
 0x409   :  { %3230 = vmatmul.mubr.msk.f32.gmra.mrb[18].mxu1 %vm747_vm1, %v574_v25 }
 0x40a   :  { %3232 = vmatprep.mubr.msk.f32.mxu1 %vm747_vm1, %v575_v28 }
 0x40c   :  { %2005 = vbcast.lane.b32.xlu0 %v4151_v7, 312  ;;  %v577_v61 = vpop.trf.xlu0 }
 0x40d   :  { %3233 = vmatmul.mubr.msk.f32.gmra.mrb[20].mxu1 %vm747_vm1, %v576_v35  ;;  %v667_v34 = vpop.trf.xlu1 }
 0x40e   :  { %3235 = vmatprep.mubr.msk.f32.mxu1 %vm747_vm1, %v577_v61 }
 0x410   :  { %2070 = vbcast.lane.b32.xlu0 %v4184_v5, 256  ;;  %v578_v17 = vpop.trf.xlu0 }
 0x411   :  { %3236 = vmatmul.mubr.msk.f32.gmra.mrb[22].mxu1 %vm747_vm1, %v578_v17  ;;  %v668_v53 = vpop.trf.xlu1  ;;  %v4281_v17 = vld [vmem:[#allocation7 + $0x8] sm:$0xff] }
 0x412   :  { %3242 = vmatprep.mubr.msk.f32.mxu1 %vm747_vm1, %v4063_v1  ;;  %v2101_v13 = vmul.f32 %v4131_v31, %v4281_v17  ;;  %v4301_v31 = vld [vmem:[#allocation7 + $0x18] sm:$0xff] }
 0x414   :  { %2078 = vbcast.lane.b32.xlu0 %v4184_v5, 272  ;;  %v635_v18 = vpop.trf.xlu0 }
 0x415   :  { %3243 = vmatmul.mubr.msk.f32.vlgmr.msra.gmra.mrb[24].mxu1 %vm747_vm1, %v4074_v2  ;;  %3258 = vmatprep.mubr.msk.f32.mxu0 %vm747_vm1, %v635_v18  ;;  %v669_v6 = vpop.trf.xlu1 }
 0x416   :  { %3341 = vmatpush3.bf16.msra.mxu1 %v3853_v42  ;;  %3245 = vmatprep.mubr.msk.f32.mxu1 %vm747_vm1, %v4079_v43 }
 0x417   :  { %3347 = vmatprep.subr.bf16.mxu1 %v3864_v47 }
 0x418   :  { %2086 = vbcast.lane.b32.xlu0 %v4184_v5, 288  ;;  %v636_v1 = vpop.trf.xlu0 }
 0x419   :  { %3246 = vmatmul.mubr.msk.f32.gmra.mrb[26].mxu1 %vm747_vm1, %v4083_v38  ;;  %3259 = vmatmul.mubr.msk.f32.vlgmr.msra.gmra.mrb[16].mxu0 %vm747_vm1, %v636_v1  ;;  %v670_v2 = vpop.trf.xlu1 }
 0x41a   :  { %3345 = vmatpush3.bf16.msra.mxu0 %v3858_v45  ;;  %3248 = vmatprep.mubr.msk.f32.mxu1 %vm747_vm1, %v4087_v22 }
 0x41c   :  { %2039 = vbcast.lane.b32.xlu0 %v4203_v57, 256  ;;  %v637_v42 = vpop.trf.xlu0 }
 0x41d   :  { %3249 = vmatmul.mubr.msk.f32.gmra.mrb[28].mxu1 %vm747_vm1, %v4091_v41  ;;  %3261 = vmatprep.mubr.msk.f32.mxu0 %vm747_vm1, %v637_v42  ;;  %v671_v43 = vpop.trf.xlu1 }
 0x41e   :  { %3251 = vmatprep.mubr.msk.f32.mxu1 %vm747_vm1, %v4097_v48 }
 0x420   :  { %2051 = vbcast.lane.b32.xlu0 %v4203_v57, 280  ;;  %v638_v38 = vpop.trf.xlu0 }
 0x421   :  { %3252 = vmatmul.mubr.msk.f32.gmra.mrb[30].mxu1 %vm747_vm1, %v4103_v63  ;;  %3262 = vmatmul.mubr.msk.f32.gmra.mrb[18].mxu0 %vm747_vm1, %v638_v38  ;;  %v672_v45 = vpop.trf.xlu1 }
 0x422   :  { %3274 = vmatprep.mubr.msk.f32.mxu1 %vm747_vm1, %v667_v34 }
 0x424   :  { %2059 = vbcast.lane.b32.xlu0 %v4203_v57, 296  ;;  %v639_v22 = vpop.trf.xlu0 }
 0x425   :  { %3275 = vmatmul.mubr.msk.f32.vlgmr.msra.gmra.mrb[32].mxu1 %vm747_vm1, %v668_v53  ;;  %3264 = vmatprep.mubr.msk.f32.mxu0 %vm747_vm1, %v639_v22  ;;  %v673_v48 = vpop.trf.xlu1  ;;  %v4283_v53 = vld [vmem:[#allocation7] sm:$0xff] }
 0x426   :  { %3349 = vmatpush3.bf16.msra.mxu1 %v3864_v47  ;;  %3277 = vmatprep.mubr.msk.f32.mxu1 %vm747_vm1, %v669_v6  ;;  %v2100_v18 = vmul.f32 %v4049_v12, %v4283_v53  ;;  %v2103_v12 = vmul.f32 %v4156_v9, %v4301_v31  ;;  %v4319_v9 = vld [vmem:[#allocation7 + $0x28] sm:$0xff] }
 0x428   :  { %2063 = vbcast.lane.b32.xlu0 %v4203_v57, 304  ;;  %v640_v41 = vpop.trf.xlu0 }
 0x429   :  { %3265 = vmatmul.mubr.msk.f32.gmra.mrb[20].mxu0 %vm747_vm1, %v640_v41  ;;  %3278 = vmatmul.mubr.msk.f32.gmra.mrb[34].mxu1 %vm747_vm1, %v670_v2  ;;  %v674_v47 = vpop.trf.xlu1 }
 0x42a   :  { %3280 = vmatprep.mubr.msk.f32.mxu1 %vm747_vm1, %v671_v43 }
 0x42c   :  { %2067 = vbcast.lane.b32.xlu0 %v4203_v57, 312  ;;  %v641_v63 = vpop.trf.xlu0 }
 0x42d   :  { %3281 = vmatmul.mubr.msk.f32.gmra.mrb[36].mxu1 %vm747_vm1, %v672_v45  ;;  %3267 = vmatprep.mubr.msk.f32.mxu0 %vm747_vm1, %v641_v63  ;;  %v4305_v45 = vld [vmem:[#allocation7 + $0x10] sm:$0xff] }
 0x42e   :  { %3283 = vmatprep.mubr.msk.f32.mxu1 %vm747_vm1, %v673_v48  ;;  %v2102_v48 = vmul.f32 %v4145_v37, %v4305_v45 }
 0x430   :  { %v642_v21 = vpop.trf.xlu0 }
 0x431   :  { %3268 = vmatmul.mubr.msk.f32.gmra.mrb[22].mxu0 %vm747_vm1, %v642_v21  ;;  %3284 = vmatmul.mubr.msk.f32.gmra.mrb[38].mxu1 %vm747_vm1, %v674_v47 }
 0x432   :  { %1943 = vbcast.lane.b32.xlu1 %v4008_v50, 312 }
 0x434   :  { %v699_v4 = vpop.trf.xlu0 }
 0x435   :  { %3290 = vmatprep.mubr.msk.f32.mxu0 %vm747_vm1, %v699_v4 }
 0x436   :  { %1950 = vbcast.lane.b32.xlu1 %v4014_v52, 264 }
 0x438   :  { %v700_v59 = vpop.trf.xlu0 }
 0x439   :  { %3291 = vmatmul.mubr.msk.f32.vlgmr.msra.gmra.mrb[24].mxu0 %vm747_vm1, %v700_v59 }
 0x43a   :  { %1958 = vbcast.lane.b32.xlu1 %v4014_v52, 280 }
 0x43c   :  { %v701_v3 = vpop.trf.xlu0 }
 0x43d   :  { %3293 = vmatprep.mubr.msk.f32.mxu0 %vm747_vm1, %v701_v3  ;;  %v2105_v3 = vmul.f32 %v4170_v29, %v4319_v9 }
 0x43e   :  { %1966 = vbcast.lane.b32.xlu1 %v4014_v52, 296 }
 0x440   :  { %v702_v25 = vpop.trf.xlu0 }
 0x441   :  { %3294 = vmatmul.mubr.msk.f32.gmra.mrb[26].mxu0 %vm747_vm1, %v702_v25 }
 0x442   :  { %1974 = vbcast.lane.b32.xlu1 %v4014_v52, 312  ;;  %v4256_v52 = vpop.permute.xlu1 %1919 }
 0x444   :  { %v703_v50 = vpop.trf.xlu0 }
 0x445   :  { %3296 = vmatprep.mubr.msk.f32.mxu0 %vm747_vm1, %v703_v50 }
 0x446   :  { %2012 = vbcast.lane.b32.xlu1 %v4127_v60, 264  ;;  %v4259_v28 = vpop.permute.xlu1 %1927 }
 0x447   :  { %5534 = vst [vmem:[#allocation18_spill] sm:$0xff] %v4259_v28 }
 0x448   :  { %v704_v51 = vpop.trf.xlu0 }
 0x449   :  { %3297 = vmatmul.mubr.msk.f32.gmra.mrb[28].mxu0 %vm747_vm1, %v704_v51 }
 0x44a   :  { %2020 = vbcast.lane.b32.xlu1 %v4127_v60, 280  ;;  %v4263_v39 = vpop.permute.xlu1 %1935 }
 0x44b   :  { %5535 = vst [vmem:[#allocation19_spill] sm:$0xff] %v4263_v39 }
 0x44c   :  { %v705_v24 = vpop.trf.xlu0 }
 0x44d   :  { %3299 = vmatprep.mubr.msk.f32.mxu0 %vm747_vm1, %v705_v24 }
 0x44e   :  { %2028 = vbcast.lane.b32.xlu1 %v4127_v60, 296 }
 0x450   :  { %v706_v54 = vpop.trf.xlu0 }
 0x451   :  { %3300 = vmatmul.mubr.msk.f32.gmra.mrb[30].mxu0 %vm747_vm1, %v706_v54 }
 0x452   :  { %2032 = vbcast.lane.b32.xlu1 %v4127_v60, 304 }
 0x456   :  { %2036 = vbcast.lane.b32.xlu1 %v4127_v60, 312 }
 0x45a   :  { %1981 = vbcast.lane.b32.xlu1 %v4151_v7, 264 }
 0x45e   :  { %1989 = vbcast.lane.b32.xlu1 %v4151_v7, 280 }
 0x462   :  { %1997 = vbcast.lane.b32.xlu1 %v4151_v7, 296 }
 0x466   :  { %2074 = vbcast.lane.b32.xlu1 %v4184_v5, 264 }
 0x46a   :  { %2082 = vbcast.lane.b32.xlu1 %v4184_v5, 280 }
 0x46e   :  { %2090 = vbcast.lane.b32.xlu1 %v4184_v5, 296 }
 0x472   :  { %2094 = vbcast.lane.b32.xlu1 %v4184_v5, 304 }
 0x476   :  { %2098 = vbcast.lane.b32.xlu1 %v4184_v5, 312 }
 0x478   :  { %v731_v60 = vpop.trf.xlu1 }
 0x479   :  { %3306 = vmatprep.mubr.msk.f32.mxu1 %vm747_vm1, %v731_v60 }
 0x47a   :  { %2043 = vbcast.lane.b32.xlu1 %v4203_v57, 264 }
 0x47c   :  { %v732_v7 = vpop.trf.xlu1 }
 0x47d   :  { %3307 = vmatmul.mubr.msk.f32.vlgmr.msra.gmra.mrb[40].mxu1 %vm747_vm1, %v732_v7 }
 0x47e   :  { %2047 = vbcast.lane.b32.xlu1 %v4203_v57, 272 }
 0x480   :  { %v733_v62 = vpop.trf.xlu1 }
 0x481   :  { %3309 = vmatprep.mubr.msk.f32.mxu1 %vm747_vm1, %v733_v62 }
 0x482   :  { %2055 = vbcast.lane.b32.xlu1 %v4203_v57, 288 }
 0x484   :  { %v734_v35 = vpop.trf.xlu1 }
 0x485   :  { %3310 = vmatmul.mubr.msk.f32.gmra.mrb[42].mxu1 %vm747_vm1, %v734_v35 }
 0x488   :  { %v735_v55 = vpop.trf.xlu1 }
 0x489   :  { %3312 = vmatprep.mubr.msk.f32.mxu1 %vm747_vm1, %v735_v55 }
 0x48c   :  { %v736_v58 = vpop.trf.xlu1 }
 0x48d   :  { %3313 = vmatmul.mubr.msk.f32.gmra.mrb[44].mxu1 %vm747_vm1, %v736_v58 }
 0x490   :  { %v737_v61 = vpop.trf.xlu1 }
 0x491   :  { %3315 = vmatprep.mubr.msk.f32.mxu1 %vm747_vm1, %v737_v61 }
 0x494   :  { %v738_v34 = vpop.trf.xlu1 }
 0x495   :  { %3316 = vmatmul.mubr.msk.f32.gmra.mrb[46].mxu1 %vm747_vm1, %v738_v34 }
 0x4a4   :  { %v4277_v19 = vpop.permute.xlu1 %1943 }
 0x4a5   :  { %5536 = vst [vmem:[#allocation20_spill] sm:$0xff] %v4277_v19 }
 0x4a8   :  { %v4279_v5 = vpop.permute.xlu1 %1950 }
 0x4ac   :  { %v4289_v6 = vpop.permute.xlu1 %1958  ;;  %v3196_v15 = vpop.f32.mrb[0].mxu1 }
 0x4ad   :  { %v4291_v1 = vsub.f32 %v3196_v15, %v2101_v13  ;;  %v838_v2 = vpop.f32.mrb[1].mxu1  ;;  %v4349_v15 = vpop.permute.xlu0 %2008 }
 0x4ae   :  { %v4293_v57 = vsub.f32 %v838_v2, %v2100_v18 }
 0x4af   :  { %5537 = vst [vmem:[#allocation21_spill] sm:$0xff] %v4291_v1  ;;  %v2229_v42 = vmul.f32 %v4291_v1, %v4291_v1 }
 0x4b0   :  { %5538 = vst [vmem:[#allocation22_spill] sm:$0xff] %v4293_v57  ;;  %v2228_v43 = vmul.f32 %v4293_v57, %v4293_v57  ;;  %v4299_v38 = vpop.permute.xlu1 %1966 }
 0x4b1   :  { %2294 = vadd.xlane.f32.xlu1 %v2229_v42  ;;  %v2129_v49 = vmul.f32 %v4299_v38, %v4319_v9 }
 0x4b2   :  { %2292 = vadd.xlane.f32.xlu0 %v2228_v43 }
 0x4b4   :  { %v4307_v22 = vpop.permute.xlu1 %1974  ;;  %v3199_v41 = vpop.f32.mrb[2].mxu1 }
 0x4b5   :  { %v4311_v63 = vsub.f32 %v3199_v41, %v2103_v12  ;;  %v848_v47 = vpop.f32.mrb[3].mxu1 }
 0x4b6   :  { %v4315_v4 = vsub.f32 %v848_v47, %v2102_v48  ;;  %v4359_v48 = vpop.permute.xlu0 %2016 }
 0x4b7   :  { %5539 = vst [vmem:[#allocation23_spill] sm:$0xff] %v4311_v63  ;;  %v2231_v21 = vmul.f32 %v4311_v63, %v4311_v63 }
 0x4b8   :  { %5540 = vst [vmem:[#allocation24_spill] sm:$0xff] %v4315_v4  ;;  %v4317_v59 = vpop.permute.xlu1 %2012  ;;  %v2230_v25 = vmul.f32 %v4315_v4, %v4315_v4 }
 0x4b9   :  { %2298 = vadd.xlane.f32.xlu0 %v2231_v21 }
 0x4bc   :  { %v3202_v37 = vpop.f32.mrb[4].mxu1  ;;  %v4327_v24 = vpop.permute.xlu1 %2020 }
 0x4bd   :  { %v4325_v50 = vsub.f32 %v3202_v37, %v2105_v3  ;;  %2296 = vadd.xlane.f32.xlu0 %v2230_v25  ;;  %v858_v51 = vpop.f32.mrb[5].mxu1  ;;  %v4365_v25 = vpop.permute.xlu0 %2024 }
 0x4bf   :  { %5541 = vst [vmem:[#allocation25_spill] sm:$0xff] %v4325_v50  ;;  %v2233_v54 = vmul.f32 %v4325_v50, %v4325_v50 }
 0x4c0   :  { %v4331_v60 = vpop.permute.xlu1 %2028 }
 0x4c1   :  { %2302 = vadd.xlane.f32.xlu0 %v2233_v54  ;;  %v1978_v57 = vpop.permute.xlu0 %1977 }
 0x4c4   :  { %v4333_v7 = vpop.f32.mrb[6].mxu1  ;;  %v4341_v55 = vpop.permute.xlu1 %2032 }
 0x4c5   :  { %v4335_v62 = vpop.f32.mrb[7].mxu1  ;;  %v1986_v44 = vpop.permute.xlu0 %1985 }
 0x4c8   :  { %v4337_v29 = vpop.f32.mrb[8].mxu1  ;;  %v4343_v34 = vpop.permute.xlu1 %2036 }
 0x4c9   :  { %v4339_v35 = vpop.f32.mrb[9].mxu1  ;;  %v4419_v38 = vpop.permute.xlu0 %1993 }
 0x4cc   :  { %v3215_v58 = vpop.f32.mrb[10].mxu1  ;;  %v1982_v43 = vpop.permute.xlu1 %1981 }
 0x4cd   :  { %v977_v61 = vpop.f32.mrb[11].mxu1  ;;  %v2133_v40 = vmul.f32 %v1982_v43, %v4281_v17 }
 0x4d0   :  { %v4345_v13 = vpop.f32.mrb[12].mxu1  ;;  %v1990_v47 = vpop.permute.xlu1 %1989 }
 0x4d1   :  { %v4347_v18 = vpop.f32.mrb[13].mxu1 }
 0x4d4   :  { %v4351_v2 = vpop.f32.mrb[14].mxu1  ;;  %v4371_v50 = vpop.permute.xlu1 %1997 }
 0x4d5   :  { %v4353_v42 = vpop.f32.mrb[15].mxu1 }
 0x4d8   :  { %v4355_v12 = vpop.f32.mrb[16].mxu1  ;;  %v4377_v1 = vpop.permute.xlu1 %2074 }
 0x4d9   :  { %v4357_v41 = vpop.f32.mrb[17].mxu1  ;;  %5548 = vst [vmem:[#allocation32_spill] sm:$0xff] %v4377_v1 }
 0x4dc   :  { %v4361_v21 = vpop.f32.mrb[18].mxu1  ;;  %v4393_v1 = vpop.permute.xlu1 %2082 }
 0x4dd   :  { %5542 = vst [vmem:[#allocation26_spill] sm:$0xff] %v4361_v21  ;;  %v4363_v3 = vpop.f32.mrb[19].mxu1  ;;  %5550 = vst [vmem:[#allocation34_spill] sm:$0xff] %v4393_v1 }
 0x4de   :  { %5543 = vst [vmem:[#allocation27_spill] sm:$0xff] %v4363_v3 }
 0x4e0   :  { %v4367_v37 = vpop.f32.mrb[20].mxu1 }
 0x4e1   :  { %5544 = vst [vmem:[#allocation28_spill] sm:$0xff] %v4367_v37  ;;  %v4369_v54 = vpop.f32.mrb[21].mxu1 }
 0x4e2   :  { %5545 = vst [vmem:[#allocation29_spill] sm:$0xff] %v4369_v54  ;;  %v2132_v54 = vmul.f32 %v1978_v57, %v4283_v53 }
 0x4e4   :  { %v4373_v4 = vpop.f32.mrb[22].mxu1 }
 0x4e5   :  { %5546 = vst [vmem:[#allocation30_spill] sm:$0xff] %v4373_v4  ;;  %v4375_v63 = vpop.f32.mrb[23].mxu1  ;;  %v4389_v4 = vld [vmem:[#allocation7 + $0x20] sm:$0xff] }
 0x4e6   :  { %5547 = vst [vmem:[#allocation31_spill] sm:$0xff] %v4375_v63  ;;  %v2111_v63 = vmul.f32 %v4114_v16, %v4301_v31  ;;  %v2104_v43 = vmul.f32 %v4053_v30, %v4389_v4  ;;  %v2110_v30 = vmul.f32 %v4033_v23, %v4305_v45 }
 0x4e8   :  { %v4379_v19 = vpop.f32.mrb[24].mxu1  ;;  %v4403_v21 = vsub.f32 %v3215_v58, %v2111_v63  ;;  %v4407_v16 = vsub.f32 %v858_v51, %v2104_v43  ;;  %v4425_v58 = vsub.f32 %v977_v61, %v2110_v30  ;;  %v2141_v30 = vmul.f32 %v4317_v59, %v4281_v17 }
 0x4e9   :  { %v4381_v46 = vpop.f32.mrb[25].mxu1 }
 0x4ea   :  { %5549 = vst [vmem:[#allocation33_spill] sm:$0xff] %v4381_v46  ;;  %v2239_v51 = vmul.f32 %v4403_v21, %v4403_v21  ;;  %v2232_v23 = vmul.f32 %v4407_v16, %v4407_v16 }
 0x4ec   :  { %v4384_v39 = vpop.f32.mrb[26].mxu1  ;;  %v3260_v37 = vpop.f32.mrb[16].mxu0 }
 0x4ed   :  { %v4387_v3 = vpop.f32.mrb[27].mxu1  ;;  %v4395_v10 = vsub.f32 %v3260_v37, %v2133_v40  ;;  %v1354_v46 = vpop.f32.mrb[17].mxu0 }
 0x4ee   :  { %v4401_v57 = vsub.f32 %v1354_v46, %v2132_v54  ;;  %v4417_v46 = vld [vmem:[#allocation7 + $0x38] sm:$0xff] }
 0x4ef   :  { %5551 = vst [vmem:[#allocation35_spill] sm:$0xff] %v4395_v10  ;;  %v2261_v28 = vmul.f32 %v4395_v10, %v4395_v10  ;;  %v2131_v63 = vmul.f32 %v4307_v22, %v4417_v46  ;;  %v2113_v22 = vmul.f32 %v4120_v0, %v4319_v9 }
 0x4f0   :  { %5552 = vst [vmem:[#allocation36_spill] sm:$0xff] %v4401_v57  ;;  %v3250_v27 = vpop.f32.mrb[28].mxu1  ;;  %v2260_v40 = vmul.f32 %v4401_v57, %v4401_v57 }
 0x4f1   :  { %v4411_v37 = vsub.f32 %v3250_v27, %v2129_v49  ;;  %v4413_v1 = vpop.f32.mrb[29].mxu1  ;;  %2358 = vadd.xlane.f32.xlu1 %v2261_v28  ;;  %v2135_v27 = vmul.f32 %v1990_v47, %v4301_v31  ;;  %v4428_v49 = vpop.permute.xlu1 %2090  ;;  %v2107_v47 = vmul.f32 %v4178_v20, %v4417_v46  ;;  %v4449_v10 = vsub.f32 %v4345_v13, %v2113_v22 }
 0x4f2   :  { %2356 = vadd.xlane.f32.xlu0 %v2260_v40  ;;  %v2134_v13 = vmul.f32 %v1986_v44, %v4305_v45  ;;  %v2143_v22 = vmul.f32 %v4327_v24, %v4301_v31 }
 0x4f3   :  { %5553 = vst [vmem:[#allocation37_spill] sm:$0xff] %v4411_v37  ;;  %5556 = vst [vmem:[#allocation40_spill] sm:$0xff] %v4449_v10 }
 0x4f4   :  { %v3253_v54 = vpop.f32.mrb[30].mxu1  ;;  %v3263_v43 = vpop.f32.mrb[18].mxu0 }
 0x4f5   :  { %v4432_v28 = vsub.f32 %v3253_v54, %v2131_v63  ;;  %v4434_v57 = vpop.f32.mrb[31].mxu1  ;;  %v4438_v40 = vsub.f32 %v3263_v43, %v2135_v27  ;;  %2314 = vadd.xlane.f32.xlu1 %v2239_v51  ;;  %v1364_v61 = vpop.f32.mrb[19].mxu0  ;;  %v2140_v63 = vmul.f32 %v4349_v15, %v4283_v53  ;;  %v2238_v54 = vmul.f32 %v4425_v58, %v4425_v58 }
 0x4f6   :  { %2300 = vadd.xlane.f32.xlu0 %v2232_v23  ;;  %v4454_v27 = vsub.f32 %v4333_v7, %v2107_v47  ;;  %v2112_v23 = vmul.f32 %v4037_v14, %v4389_v4  ;;  %v4460_v15 = vpop.permute.xlu0 %2001  ;;  %v2142_v7 = vmul.f32 %v4359_v48, %v4305_v45  ;;  %v2241_v47 = vmul.f32 %v4449_v10, %v4449_v10 }
 0x4f7   :  { %5554 = vst [vmem:[#allocation38_spill] sm:$0xff] %v4432_v28  ;;  %5555 = vst [vmem:[#allocation39_spill] sm:$0xff] %v4438_v40  ;;  %v2263_v0 = vmul.f32 %v4438_v40, %v4438_v40  ;;  %v4467_v40 = vpop.permute.xlu1 %2094  ;;  %v2115_v48 = vmul.f32 %v4124_v32, %v4417_v46 }
 0x4f8   :  { %v3276_v51 = vpop.f32.mrb[32].mxu1  ;;  %v4474_v14 = vsub.f32 %v4347_v18, %v2112_v23  ;;  %v2235_v44 = vmul.f32 %v4454_v27, %v4454_v27  ;;  %v2144_v23 = vmul.f32 %v4365_v25, %v4389_v4 }
 0x4f9   :  { %v4456_v20 = vsub.f32 %v3276_v51, %v2141_v30  ;;  %v1483_v59 = vpop.f32.mrb[33].mxu1  ;;  %2312 = vadd.xlane.f32.xlu1 %v2238_v54  ;;  %v4478_v54 = vsub.f32 %v1364_v61, %v2134_v13  ;;  %v2145_v61 = vmul.f32 %v4331_v60, %v4319_v9 }
 0x4fa   :  { %v4462_v43 = vsub.f32 %v1483_v59, %v2140_v63  ;;  %2362 = vadd.xlane.f32.xlu0 %v2263_v0  ;;  %v4484_v59 = vld [vmem:[#allocation7 + $0x30] sm:$0xff]  ;;  %v2006_v13 = vpop.permute.xlu0 %2005 }
 0x4fb   :  { %5557 = vst [vmem:[#allocation41_spill] sm:$0xff] %v4456_v20  ;;  %5559 = vst [vmem:[#allocation43_spill] sm:$0xff] %v4478_v54  ;;  %v2106_v18 = vmul.f32 %v4057_v33, %v4484_v59  ;;  %v2262_v33 = vmul.f32 %v4478_v54, %v4478_v54  ;;  %v2114_v25 = vmul.f32 %v4043_v8, %v4484_v59 }
 0x4fc   :  { %5558 = vst [vmem:[#allocation42_spill] sm:$0xff] %v4462_v43  ;;  %v3266_v30 = vpop.f32.mrb[20].mxu0  ;;  %v3279_v63 = vpop.f32.mrb[34].mxu1 }
 0x4fd   :  { %v4480_v24 = vsub.f32 %v3279_v63, %v2143_v22  ;;  %v1493_v51 = vpop.f32.mrb[35].mxu1  ;;  %v4482_v0 = vpop.f32.mrb[21].mxu0  ;;  %2318 = vadd.xlane.f32.xlu1 %v2241_v47  ;;  %v2240_v22 = vmul.f32 %v4474_v14, %v4474_v14  ;;  %v4499_v63 = vsub.f32 %v4351_v2, %v2115_v48  ;;  %v2109_v2 = vmul.f32 %v4107_v56, %v4281_v17 }
 0x4fe   :  { %v4488_v10 = vsub.f32 %v1493_v51, %v2142_v7  ;;  %2306 = vadd.xlane.f32.xlu0 %v2235_v44  ;;  %v4502_v7 = vsub.f32 %v4335_v62, %v2106_v18  ;;  %v4510_v44 = vpop.permute.xlu1 %2098  ;;  %v2139_v62 = vmul.f32 %v2006_v13, %v4417_v46  ;;  %v2147_v48 = vmul.f32 %v4343_v34, %v4417_v46  ;;  %v4537_v54 = vpop.permute.xlu0 %2070 }
 0x4ff   :  { %5560 = vst [vmem:[#allocation44_spill] sm:$0xff] %v4480_v24  ;;  %v2146_v18 = vmul.f32 %v4341_v55, %v4484_v59  ;;  %v2243_v8 = vmul.f32 %v4499_v63, %v4499_v63  ;;  %v4529_v13 = vsub.f32 %v4337_v29, %v2109_v2 }
 0x500   :  { %5561 = vst [vmem:[#allocation45_spill] sm:$0xff] %v4488_v10  ;;  %v3282_v32 = vpop.f32.mrb[36].mxu1  ;;  %v2234_v56 = vmul.f32 %v4502_v7, %v4502_v7 }
 0x501   :  { %v4506_v47 = vsub.f32 %v3282_v32, %v2145_v61  ;;  %v1503_v60 = vpop.f32.mrb[37].mxu1  ;;  %2316 = vadd.xlane.f32.xlu1 %v2240_v22  ;;  %v4524_v61 = vsub.f32 %v4353_v42, %v2114_v25  ;;  %v2108_v25 = vmul.f32 %v4029_v11, %v4283_v53 }
 0x502   :  { %v4512_v51 = vsub.f32 %v1503_v60, %v2144_v23  ;;  %2360 = vadd.xlane.f32.xlu0 %v2262_v33  ;;  %v2117_v60 = vmul.f32 %v4256_v52, %v4281_v17 }
 0x503   :  { %5562 = vst [vmem:[#allocation46_spill] sm:$0xff] %v4506_v47  ;;  %v2242_v29 = vmul.f32 %v4524_v61, %v4524_v61  ;;  %v4551_v52 = vsub.f32 %v4339_v35, %v2108_v25 }
 0x504   :  { %5563 = vst [vmem:[#allocation47_spill] sm:$0xff] %v4512_v51  ;;  %v3269_v23 = vpop.f32.mrb[22].mxu0  ;;  %v3285_v22 = vpop.f32.mrb[38].mxu1  ;;  %v4546_v2 = vsub.f32 %v4355_v12, %v2117_v60  ;;  %v2136_v60 = vmul.f32 %v4419_v38, %v4389_v4  ;;  %v2138_v38 = vmul.f32 %v4460_v15, %v4484_v59  ;;  %v2116_v15 = vmul.f32 %v4061_v36, %v4283_v53 }
 0x505   :  { %v4531_v32 = vsub.f32 %v3269_v23, %v2139_v62  ;;  %v4533_v34 = vsub.f32 %v3285_v22, %v2147_v48  ;;  %v1513_v33 = vpop.f32.mrb[39].mxu1  ;;  %v1384_v55 = vpop.f32.mrb[23].mxu0  ;;  %2322 = vadd.xlane.f32.xlu1 %v2243_v8  ;;  %v2237_v48 = vmul.f32 %v4529_v13, %v4529_v13  ;;  %v2236_v22 = vmul.f32 %v4551_v52, %v4551_v52 }
 0x506   :  { %v4539_v42 = vsub.f32 %v1513_v33, %v2146_v18  ;;  %2304 = vadd.xlane.f32.xlu0 %v2234_v56  ;;  %5567 = vst [vmem:[#allocation51_spill] sm:$0xff] %v4546_v2  ;;  %v2044_v62 = vpop.permute.xlu1 %2043  ;;  %v2137_v18 = vmul.f32 %v4371_v50, %v4319_v9  ;;  %v4556_v8 = vpop.permute.xlu0 %2078  ;;  %v2245_v12 = vmul.f32 %v4546_v2, %v4546_v2 }
 0x507   :  { %5564 = vst [vmem:[#allocation48_spill] sm:$0xff] %v4531_v32  ;;  %5565 = vst [vmem:[#allocation49_spill] sm:$0xff] %v4533_v34  ;;  %v2149_v11 = vmul.f32 %v2044_v62, %v4281_v17  ;;  %v2125_v50 = vmul.f32 %v4279_v5, %v4281_v17  ;;  %v4578_v62 = vsub.f32 %v4482_v0, %v2136_v60 }
 0x508   :  { %5566 = vst [vmem:[#allocation50_spill] sm:$0xff] %v4539_v42  ;;  %v4562_v56 = vsub.f32 %v3266_v30, %v2137_v18  ;;  %v2127_v5 = vmul.f32 %v4289_v6, %v4301_v31  ;;  %v2126_v6 = vmul.f32 %v4089_v26, %v4305_v45  ;;  %v4605_v60 = vsub.f32 %v4357_v41, %v2116_v15  ;;  %v5577_v41 = vld [vmem:[#allocation16_spill] sm:$0xff] }
 0x509   :  { %2320 = vadd.xlane.f32.xlu1 %v2242_v29  ;;  %v4573_v29 = vsub.f32 %v4379_v19, %v2125_v50  ;;  %5571 = vst [vmem:[#allocation55_spill] sm:$0xff] %v4578_v62  ;;  %v2264_v0 = vmul.f32 %v4578_v62, %v4578_v62  ;;  %v2257_v15 = vmul.f32 %v4411_v37, %v4411_v37 }
 0x50a   :  { %2310 = vadd.xlane.f32.xlu0 %v2237_v48  ;;  %5568 = vst [vmem:[#allocation52_spill] sm:$0xff] %v4562_v56  ;;  %v2265_v30 = vmul.f32 %v4562_v56, %v4562_v56  ;;  %v4580_v48 = vpop.permute.xlu0 %2086  ;;  %v4589_v18 = vsub.f32 %v4384_v39, %v2127_v5  ;;  %v4602_v50 = vsub.f32 %v4387_v3, %v2126_v6  ;;  %5575 = vst [vmem:[#allocation59_spill] sm:$0xff] %v4605_v60 }
 0x50b   :  { %5570 = vst [vmem:[#allocation54_spill] sm:$0xff] %v4573_v29  ;;  %v2253_v19 = vmul.f32 %v4573_v29, %v4573_v29 }
 0x50c   :  { %v3292_v23 = vpop.f32.mrb[24].mxu0  ;;  %5572 = vst [vmem:[#allocation56_spill] sm:$0xff] %v4589_v18  ;;  %v2255_v39 = vmul.f32 %v4589_v18, %v4589_v18  ;;  %5574 = vst [vmem:[#allocation58_spill] sm:$0xff] %v4602_v50  ;;  %v2254_v36 = vmul.f32 %v4602_v50, %v4602_v50 }
 0x50d   :  { %v4564_v35 = vsub.f32 %v3292_v23, %v2149_v11  ;;  %v1612_v33 = vpop.f32.mrb[25].mxu0  ;;  %2326 = vadd.xlane.f32.xlu1 %v2245_v12  ;;  %v4593_v12 = vsub.f32 %v1384_v55, %v2138_v38  ;;  %v2128_v38 = vmul.f32 %v5577_v41, %v4389_v4 }
 0x50e   :  { %2308 = vadd.xlane.f32.xlu0 %v2236_v22  ;;  %v2040_v22 = vpop.permute.xlu0 %2039 }
 0x50f   :  { %5569 = vst [vmem:[#allocation53_spill] sm:$0xff] %v4564_v35  ;;  %v2277_v25 = vmul.f32 %v4564_v35, %v4564_v35  ;;  %5573 = vst [vmem:[#allocation57_spill] sm:$0xff] %v4593_v12  ;;  %v2266_v55 = vmul.f32 %v4593_v12, %v4593_v12  ;;  %v2148_v26 = vmul.f32 %v2040_v22, %v4283_v53 }
 0x510   :  { %v4623_v22 = vsub.f32 %v4413_v1, %v2128_v38 }
 0x511   :  { %2390 = vadd.xlane.f32.xlu1 %v2277_v25  ;;  %v4614_v5 = vsub.f32 %v1612_v33, %v2148_v26  ;;  %v5582_v26 = vld [vmem:[#allocation17_spill] sm:$0xff] }
 0x512   :  { %2366 = vadd.xlane.f32.xlu0 %v2265_v30  ;;  %v2244_v30 = vmul.f32 %v4605_v60, %v4605_v60  ;;  %v2052_v6 = vpop.permute.xlu0 %2051  ;;  %5579 = vst [vmem:[#allocation16_spill] sm:$0xff] %v4623_v22 }
 0x513   :  { %5576 = vst [vmem:[#allocation60_spill] sm:$0xff] %v4614_v5  ;;  %v2276_v33 = vmul.f32 %v4614_v5, %v4614_v5  ;;  %v2151_v41 = vmul.f32 %v2052_v6, %v4301_v31  ;;  %v2048_v6 = vpop.permute.xlu1 %2047 }
 0x514   :  { %v3295_v11 = vpop.f32.mrb[26].mxu0 }
 0x515   :  { %v1622_v23 = vpop.f32.mrb[27].mxu0  ;;  %2342 = vadd.xlane.f32.xlu1 %v2253_v19  ;;  %v5578_v19 = vld [vmem:[#allocation18_spill] sm:$0xff] }
 0x516   :  { %2364 = vadd.xlane.f32.xlu0 %v2264_v0  ;;  %v2119_v0 = vmul.f32 %v5578_v19, %v4301_v31 }
 0x519   :  { %2346 = vadd.xlane.f32.xlu1 %v2255_v39  ;;  %v5580_v39 = vld [vmem:[#allocation26_spill] sm:$0xff] }
 0x51a   :  { %2368 = vadd.xlane.f32.xlu0 %v2266_v55  ;;  %v4626_v55 = vsub.f32 %v5580_v39, %v2119_v0  ;;  %v4642_v0 = vsub.f32 %v3295_v11, %v2151_v41  ;;  %v2150_v11 = vmul.f32 %v2048_v6, %v4305_v45  ;;  %v2269_v41 = vmul.f32 %v4456_v20, %v4456_v20 }
 0x51c   :  { %v3298_v25 = vpop.f32.mrb[28].mxu0  ;;  %5581 = vst [vmem:[#allocation18_spill] sm:$0xff] %v4626_v55  ;;  %v2247_v38 = vmul.f32 %v4626_v55, %v4626_v55  ;;  %5584 = vst [vmem:[#allocation17_spill] sm:$0xff] %v4642_v0 }
 0x51d   :  { %v1632_v3 = vpop.f32.mrb[29].mxu0  ;;  %2344 = vadd.xlane.f32.xlu1 %v2254_v36  ;;  %v2130_v36 = vmul.f32 %v5582_v26, %v4484_v59 }
 0x51e   :  { %2324 = vadd.xlane.f32.xlu0 %v2244_v30  ;;  %v2256_v30 = vmul.f32 %v4623_v22, %v4623_v22  ;;  %v5586_v22 = vld [vmem:[#allocation27_spill] sm:$0xff] }
 0x51f   :  { %v4636_v19 = vsub.f32 %v4434_v57, %v2130_v36  ;;  %v2279_v36 = vmul.f32 %v4642_v0, %v4642_v0  ;;  %v5590_v0 = vld [vmem:[#allocation28_spill] sm:$0xff] }
 0x521   :  { %2350 = vadd.xlane.f32.xlu1 %v2257_v15  ;;  %5583 = vst [vmem:[#allocation26_spill] sm:$0xff] %v4636_v19  ;;  %v5585_v15 = vld [vmem:[#allocation12_spill] sm:$0xff] }
 0x522   :  { %2388 = vadd.xlane.f32.xlu0 %v2276_v33  ;;  %v2118_v26 = vmul.f32 %v5585_v15, %v4305_v45  ;;  %v2258_v33 = vmul.f32 %v4636_v19, %v4636_v19  ;;  %v5589_v15 = vld [vmem:[#allocation19_spill] sm:$0xff] }
 0x524   :  { %v4638_v1 = vpop.f32.mrb[30].mxu0  ;;  %v4649_v57 = vsub.f32 %v5586_v22, %v2118_v26  ;;  %v2121_v22 = vmul.f32 %v5589_v15, %v4319_v9  ;;  %v2060_v26 = vpop.permute.xlu0 %2059 }
 0x525   :  { %v1642_v39 = vpop.f32.mrb[31].mxu0  ;;  %2348 = vadd.xlane.f32.xlu1 %v2256_v30  ;;  %v2056_v15 = vpop.permute.xlu1 %2055 }
 0x526   :  { %2330 = vadd.xlane.f32.xlu0 %v2247_v38  ;;  %5587 = vst [vmem:[#allocation12_spill] sm:$0xff] %v4649_v57  ;;  %v2246_v30 = vmul.f32 %v4649_v57, %v4649_v57  ;;  %v4658_v38 = vsub.f32 %v1622_v23, %v2150_v11  ;;  %v4665_v6 = vsub.f32 %v5590_v0, %v2121_v22 }
 0x527   :  { %v2153_v57 = vmul.f32 %v2060_v26, %v4319_v9  ;;  %v2270_v23 = vmul.f32 %v4488_v10, %v4488_v10  ;;  %v2273_v22 = vmul.f32 %v4506_v47, %v4506_v47 }
 0x528   :  { %5588 = vst [vmem:[#allocation27_spill] sm:$0xff] %v4658_v38  ;;  %5591 = vst [vmem:[#allocation19_spill] sm:$0xff] %v4665_v6  ;;  %v2249_v11 = vmul.f32 %v4665_v6, %v4665_v6  ;;  %v2152_v6 = vmul.f32 %v2056_v15, %v4389_v4 }
 0x529   :  { %2352 = vadd.xlane.f32.xlu1 %v2258_v33  ;;  %v2271_v33 = vmul.f32 %v4480_v24, %v4480_v24 }
 0x52a   :  { %2394 = vadd.xlane.f32.xlu0 %v2279_v36  ;;  %v2278_v36 = vmul.f32 %v4658_v38, %v4658_v38 }
 0x52d   :  { %2374 = vadd.xlane.f32.xlu1 %v2269_v41  ;;  %v4674_v41 = vsub.f32 %v3298_v25, %v2153_v57  ;;  %v2272_v25 = vmul.f32 %v4512_v51, %v4512_v51 }
 0x52e   :  { %2328 = vadd.xlane.f32.xlu0 %v2246_v30  ;;  %v5593_v30 = vld [vmem:[#allocation13_spill] sm:$0xff] }
 0x52f   :  { %5592 = vst [vmem:[#allocation28_spill] sm:$0xff] %v4674_v41  ;;  %v2120_v0 = vmul.f32 %v5593_v30, %v4389_v4 }
 0x531   :  { %2378 = vadd.xlane.f32.xlu1 %v2271_v33  ;;  %v5594_v33 = vld [vmem:[#allocation29_spill] sm:$0xff] }
 0x532   :  { %2392 = vadd.xlane.f32.xlu0 %v2278_v36  ;;  %v4681_v26 = vsub.f32 %v5594_v33, %v2120_v0  ;;  %v2281_v36 = vmul.f32 %v4674_v41, %v4674_v41  ;;  %v2064_v0 = vpop.permute.xlu0 %2063  ;;  %v5598_v33 = vld [vmem:[#allocation31_spill] sm:$0xff] }
 0x534   :  { %5595 = vst [vmem:[#allocation13_spill] sm:$0xff] %v4681_v26  ;;  %v2248_v57 = vmul.f32 %v4681_v26, %v4681_v26  ;;  %v2154_v26 = vmul.f32 %v2064_v0, %v4484_v59 }
 0x535   :  { %2376 = vadd.xlane.f32.xlu1 %v2270_v23  ;;  %v4690_v23 = vsub.f32 %v1632_v3, %v2152_v6 }
 0x536   :  { %2334 = vadd.xlane.f32.xlu0 %v2249_v11  ;;  %v5597_v11 = vld [vmem:[#allocation14_spill] sm:$0xff]  ;;  %v4704_v6 = vsub.f32 %v1642_v39, %v2154_v26  ;;  %v2156_v39 = vmul.f32 %v4537_v54, %v4283_v53 }
 0x537   :  { %5596 = vst [vmem:[#allocation29_spill] sm:$0xff] %v4690_v23  ;;  %v2122_v30 = vmul.f32 %v5597_v11, %v4484_v59  ;;  %v5602_v11 = vld [vmem:[#allocation33_spill] sm:$0xff] }
 0x538   :  { %5600 = vst [vmem:[#allocation31_spill] sm:$0xff] %v4704_v6 }
 0x539   :  { %2382 = vadd.xlane.f32.xlu1 %v2273_v22  ;;  %v2274_v22 = vmul.f32 %v4539_v42, %v4539_v42  ;;  %v4697_v15 = vsub.f32 %v5598_v33, %v2122_v30  ;;  %v2282_v30 = vmul.f32 %v4704_v6, %v4704_v6 }
 0x53a   :  { %2398 = vadd.xlane.f32.xlu0 %v2281_v36  ;;  %v2280_v36 = vmul.f32 %v4690_v23, %v4690_v23 }
 0x53b   :  { %5599 = vst [vmem:[#allocation14_spill] sm:$0xff] %v4697_v15  ;;  %v2250_v3 = vmul.f32 %v4697_v15, %v4697_v15 }
 0x53d   :  { %2380 = vadd.xlane.f32.xlu1 %v2272_v25  ;;  %v5601_v25 = vld [vmem:[#allocation15_spill] sm:$0xff] }
 0x53e   :  { %2332 = vadd.xlane.f32.xlu0 %v2248_v57  ;;  %v2124_v57 = vmul.f32 %v5601_v25, %v4283_v53  ;;  %v5608_v53 = vld [vmem:[#allocation30_spill] sm:$0xff] }
 0x540   :  { %v4709_v42 = vsub.f32 %v5602_v11, %v2124_v57  ;;  %v5607_v11 = vld [vmem:[#allocation20_spill] sm:$0xff] }
 0x541   :  { %2384 = vadd.xlane.f32.xlu1 %v2274_v22  ;;  %v5604_v22 = vld [vmem:[#allocation32_spill] sm:$0xff] }
 0x542   :  { %2396 = vadd.xlane.f32.xlu0 %v2280_v36  ;;  %5603 = vst [vmem:[#allocation15_spill] sm:$0xff] %v4709_v42  ;;  %v2252_v0 = vmul.f32 %v4709_v42, %v4709_v42  ;;  %v2157_v33 = vmul.f32 %v5604_v22, %v4281_v17  ;;  %v2268_v36 = vmul.f32 %v4462_v43, %v4462_v43 }
 0x546   :  { %2336 = vadd.xlane.f32.xlu0 %v2250_v3 }
 0x54a   :  { %2400 = vadd.xlane.f32.xlu0 %v2282_v30  ;;  %v2123_v30 = vmul.f32 %v5607_v11, %v4417_v46 }
 0x54c   :  { %v4732_v54 = vsub.f32 %v5608_v53, %v2123_v30  ;;  %v2275_v53 = vmul.f32 %v4533_v34, %v4533_v34 }
 0x54e   :  { %2340 = vadd.xlane.f32.xlu0 %v2252_v0  ;;  %5609 = vst [vmem:[#allocation20_spill] sm:$0xff] %v4732_v54  ;;  %v5610_v0 = vld [vmem:[#allocation34_spill] sm:$0xff] }
 0x54f   :  { %v2159_v22 = vmul.f32 %v5610_v0, %v4301_v31 }
 0x550   :  { %v3308_v26 = vpop.f32.mrb[40].mxu1 }
 0x551   :  { %v4721_v3 = vsub.f32 %v3308_v26, %v2157_v33  ;;  %v1741_v25 = vpop.f32.mrb[41].mxu1  ;;  %v2259_v33 = vmul.f32 %v4432_v28, %v4432_v28  ;;  %v2068_v26 = vpop.permute.xlu0 %2067 }
 0x552   :  { %v4723_v57 = vsub.f32 %v1741_v25, %v2156_v39  ;;  %2372 = vadd.xlane.f32.xlu0 %v2268_v36  ;;  %v2158_v39 = vmul.f32 %v4556_v8, %v4305_v45  ;;  %v2251_v36 = vmul.f32 %v4732_v54, %v4732_v54  ;;  %v2155_v31 = vmul.f32 %v2068_v26, %v4417_v46 }
 0x553   :  { %5605 = vst [vmem:[#allocation33_spill] sm:$0xff] %v4721_v3  ;;  %v2285_v6 = vmul.f32 %v4721_v3, %v4721_v3  ;;  %v2267_v45 = vmul.f32 %v4531_v32, %v4531_v32 }
 0x554   :  { %5606 = vst [vmem:[#allocation32_spill] sm:$0xff] %v4723_v57  ;;  %v2284_v17 = vmul.f32 %v4723_v57, %v4723_v57  ;;  %v4752_v8 = vsub.f32 %v4638_v1, %v2155_v31 }
 0x555   :  { %2406 = vadd.xlane.f32.xlu1 %v2285_v6 }
 0x556   :  { %2404 = vadd.xlane.f32.xlu0 %v2284_v17  ;;  %5613 = vst [vmem:[#allocation61_spill] sm:$0xff] %v4752_v8  ;;  %v2161_v17 = vmul.f32 %v4428_v49, %v4319_v9  ;;  %v2163_v49 = vmul.f32 %v4510_v44, %v4417_v46 }
 0x558   :  { %v3311_v25 = vpop.f32.mrb[42].mxu1 }
 0x559   :  { %v4742_v11 = vsub.f32 %v3311_v25, %v2159_v22  ;;  %v1751_v30 = vpop.f32.mrb[43].mxu1  ;;  %2354 = vadd.xlane.f32.xlu1 %v2259_v33  ;;  %v2160_v22 = vmul.f32 %v4580_v48, %v4389_v4  ;;  %v2162_v48 = vmul.f32 %v4467_v40, %v4484_v59 }
 0x55a   :  { %v4744_v6 = vsub.f32 %v1751_v30, %v2158_v39  ;;  %2338 = vadd.xlane.f32.xlu0 %v2251_v36  ;;  %v2283_v39 = vmul.f32 %v4752_v8, %v4752_v8 }
 0x55b   :  { %5611 = vst [vmem:[#allocation30_spill] sm:$0xff] %v4742_v11  ;;  %v2287_v0 = vmul.f32 %v4742_v11, %v4742_v11 }
 0x55c   :  { %5612 = vst [vmem:[#allocation34_spill] sm:$0xff] %v4744_v6  ;;  %v2286_v9 = vmul.f32 %v4744_v6, %v4744_v6 }
 0x55d   :  { %2386 = vadd.xlane.f32.xlu1 %v2275_v53 }
 0x55e   :  { %2370 = vadd.xlane.f32.xlu0 %v2267_v45 }
 0x560   :  { %v3314_v33 = vpop.f32.mrb[44].mxu1 }
 0x561   :  { %v4762_v26 = vsub.f32 %v3314_v33, %v2161_v17  ;;  %v1761_v25 = vpop.f32.mrb[45].mxu1  ;;  %2410 = vadd.xlane.f32.xlu1 %v2287_v0  ;;  %v2293_v17 = vpop.xlane.xlu0 %2292 }
 0x562   :  { %v4764_v1 = vsub.f32 %v1761_v25, %v2160_v22  ;;  %2402 = vadd.xlane.f32.xlu0 %v2283_v39  ;;  %v2295_v0 = vpop.xlane.xlu1 %2294  ;;  %v2420_v39 = vmax.f32 %v2293_v17, 1e-24 }
 0x563   :  { %5614 = vst [vmem:[#allocation62_spill] sm:$0xff] %v4762_v26  ;;  %v2289_v4 = vmul.f32 %v4762_v26, %v4762_v26  ;;  %v2421_v22 = vmax.f32 %v2295_v0, 1e-24 }
 0x564   :  { %5615 = vst [vmem:[#allocation63_spill] sm:$0xff] %v4764_v1  ;;  %v2288_v45 = vmul.f32 %v4764_v1, %v4764_v1 }
 0x565   :  { %2408 = vadd.xlane.f32.xlu1 %v2286_v9  ;;  %v4782_v44 = vpop.xlane.xlu0 %2298  ;;  %3459 = vrsqrt.f32 %v2421_v22 }
 0x566   :  { %3461 = vrsqrt.f32 %v2420_v39 }
 0x568   :  { %v3317_v36 = vpop.f32.mrb[46].mxu1 }
 0x569   :  { %v4774_v30 = vsub.f32 %v3317_v36, %v2163_v49  ;;  %v1771_v31 = vpop.f32.mrb[47].mxu1  ;;  %2414 = vadd.xlane.f32.xlu1 %v2289_v4  ;;  %v2297_v59 = vpop.xlane.xlu0 %2296 }
 0x56a   :  { %v4776_v53 = vsub.f32 %v1771_v31, %v2162_v48  ;;  %v2422_v4 = vmax.f32 %v2297_v59, 1e-24 }
 0x56b   :  { %5616 = vst [vmem:[#allocation64_spill] sm:$0xff] %v4774_v30  ;;  %v2291_v40 = vmul.f32 %v4774_v30, %v4774_v30 }
 0x56c   :  { %5617 = vst [vmem:[#allocation65_spill] sm:$0xff] %v4776_v53  ;;  %v2290_v46 = vmul.f32 %v4776_v53, %v4776_v53 }
 0x56d   :  { %2412 = vadd.xlane.f32.xlu1 %v2288_v45  ;;  %v4786_v33 = vpop.xlane.xlu0 %2302  ;;  %v2423_v45 = vmax.f32 %v4782_v44, 1e-24 }
 0x56f   :  { %v4793_v53 = vpop.eup %3459 }
 0x570   :  { %v4795_v22 = vpop.eup %3461  ;;  %v2613_v3 = vmul.f32 %v4793_v53, %v2295_v0 }
 0x571   :  { %2416 = vadd.xlane.f32.xlu1 %v2290_v46  ;;  %v2612_v8 = vmul.f32 %v4795_v22, %v2293_v17 }
 0x572   :  { %v2677_v0 = vmul.f32 %v4793_v53, %v2613_v3 }
 0x573   :  { %v2676_v17 = vmul.f32 %v4795_v22, %v2612_v8 }
 0x575   :  { %2418 = vadd.xlane.f32.xlu1 %v2291_v40 }
 0x57e   :  { %v2359_v25 = vpop.xlane.xlu1 %2358 }
 0x57f   :  { %v2453_v9 = vmax.f32 %v2359_v25, 1e-24  ;;  %v2357_v49 = vpop.xlane.xlu0 %2356 }
 0x580   :  { %v2452_v48 = vmax.f32 %v2357_v49, 1e-24 }
 0x581   :  { %3463 = vrsqrt.f32 %v2453_v9 }
 0x582   :  { %3465 = vrsqrt.f32 %v2452_v48  ;;  %v4788_v36 = vpop.xlane.xlu1 %2314  ;;  %v2425_v48 = vmax.f32 %v4786_v33, 1e-24 }
 0x583   :  { %v2301_v31 = vpop.xlane.xlu0 %2300  ;;  %3467 = vrsqrt.f32 %v2422_v4 }
 0x584   :  { %v2424_v46 = vmax.f32 %v2301_v31, 1e-24  ;;  %3469 = vrsqrt.f32 %v2423_v45 }
 0x586   :  { %v4791_v40 = vpop.xlane.xlu1 %2312  ;;  %3471 = vrsqrt.f32 %v2424_v46 }
 0x587   :  { %v2363_v30 = vpop.xlane.xlu0 %2362  ;;  %3473 = vrsqrt.f32 %v2425_v48  ;;  %v2430_v3 = vmax.f32 %v4791_v40, 1e-24 }
 0x588   :  { %v2455_v6 = vmax.f32 %v2363_v30, 1e-24 }
 0x58a   :  { %v4797_v39 = vpop.xlane.xlu1 %2318  ;;  %3475 = vrsqrt.f32 %v2455_v6 }
 0x58b   :  { %v4799_v9 = vpop.eup %3463  ;;  %v4802_v1 = vpop.xlane.xlu0 %2306 }
 0x58c   :  { %v4804_v4 = vpop.eup %3465  ;;  %v2645_v26 = vmul.f32 %v4799_v9, %v2359_v25  ;;  %v2427_v25 = vmax.f32 %v4802_v1, 1e-24 }
 0x58d   :  { %v2644_v11 = vmul.f32 %v4804_v4, %v2357_v49  ;;  %v4808_v57 = vpop.eup %3467 }
 0x58e   :  { %v2709_v45 = vmul.f32 %v4799_v9, %v2645_v26  ;;  %v4811_v46 = vpop.xlane.xlu1 %2316  ;;  %v2614_v49 = vmul.f32 %v4808_v57, %v2297_v59  ;;  %v4820_v26 = vpop.eup %3469 }
 0x58f   :  { %v2708_v23 = vmul.f32 %v4804_v4, %v2644_v11  ;;  %v2361_v32 = vpop.xlane.xlu0 %2360 }
 0x590   :  { %v2454_v34 = vmax.f32 %v2361_v32, 1e-24  ;;  %v4824_v43 = vpop.eup %3471  ;;  %v2678_v6 = vmul.f32 %v4808_v57, %v2614_v49 }
 0x591   :  { %v2792_v54 = vadd.f32 %v2709_v45, %v2708_v23  ;;  %v2740_v23 = vadd.f32 %v2677_v0, %v2676_v17  ;;  %v2616_v59 = vmul.f32 %v4824_v43, %v2301_v31  ;;  %v4833_v15 = vpop.eup %3473  ;;  %v2432_v31 = vmax.f32 %v4811_v46, 1e-24 }
 0x592   :  { %3477 = vrsqrt.f32 %v2454_v34  ;;  %v4818_v28 = vpop.xlane.xlu1 %2322  ;;  %v2615_v34 = vmul.f32 %v4820_v26, %v4782_v44  ;;  %v2617_v47 = vmul.f32 %v4833_v15, %v4786_v33 }
 0x593   :  { %v2305_v48 = vpop.xlane.xlu0 %2304  ;;  %3479 = vrsqrt.f32 %v2427_v25  ;;  %v2741_v51 = vadd.f32 %v2740_v23, %v2678_v6  ;;  %v2431_v25 = vmax.f32 %v4788_v36, 1e-24  ;;  %v2680_v44 = vmul.f32 %v4824_v43, %v2616_v59 }
 0x594   :  { %v2426_v11 = vmax.f32 %v2305_v48, 1e-24  ;;  %v4836_v41 = vpop.eup %3475  ;;  %v2679_v0 = vmul.f32 %v4820_v26, %v2615_v34  ;;  %v2433_v6 = vmax.f32 %v4797_v39, 1e-24 }
 0x595   :  { %v2647_v10 = vmul.f32 %v4836_v41, %v2363_v30 }
 0x596   :  { %3481 = vrsqrt.f32 %v2426_v11  ;;  %v4827_v42 = vpop.xlane.xlu1 %2320 }
 0x597   :  { %v2311_v45 = vpop.xlane.xlu0 %2310  ;;  %v2434_v33 = vmax.f32 %v4827_v42, 1e-24 }
 0x598   :  { %v2429_v8 = vmax.f32 %v2311_v45, 1e-24 }
 0x59a   :  { %3483 = vrsqrt.f32 %v2429_v8  ;;  %v4838_v49 = vpop.xlane.xlu1 %2326  ;;  %v2742_v8 = vadd.f32 %v2741_v51, %v2679_v0  ;;  %v2681_v51 = vmul.f32 %v4833_v15, %v2617_v47 }
 0x59b   :  { %v2309_v17 = vpop.xlane.xlu0 %2308  ;;  %3485 = vrsqrt.f32 %v2430_v3 }
 0x59c   :  { %v4843_v11 = vpop.eup %3477  ;;  %v2428_v23 = vmax.f32 %v2309_v17, 1e-24  ;;  %3487 = vrsqrt.f32 %v2431_v25  ;;  %v2743_v24 = vadd.f32 %v2742_v8, %v2680_v44  ;;  %v2711_v25 = vmul.f32 %v4836_v41, %v2647_v10 }
 0x59d   :  { %v2646_v34 = vmul.f32 %v4843_v11, %v2361_v32  ;;  %v4850_v38 = vpop.eup %3479  ;;  %v2435_v32 = vmax.f32 %v4818_v28, 1e-24 }
 0x59e   :  { %3489 = vrsqrt.f32 %v2428_v23  ;;  %v4852_v59 = vpop.xlane.xlu1 %2390  ;;  %v2619_v0 = vmul.f32 %v4850_v38, %v4802_v1  ;;  %v2744_v8 = vadd.f32 %v2743_v24, %v2681_v51 }
 0x59f   :  { %3491 = vrsqrt.f32 %v2432_v31  ;;  %v2710_v20 = vmul.f32 %v4843_v11, %v2646_v34  ;;  %v4856_v3 = vpop.xlane.xlu0 %2366 }
 0x5a0   :  { %v4858_v19 = vpop.eup %3481  ;;  %3493 = vrsqrt.f32 %v2433_v6  ;;  %v2457_v30 = vmax.f32 %v4856_v3, 1e-24  ;;  %v2683_v10 = vmul.f32 %v4850_v38, %v2619_v0 }
 0x5a1   :  { %v2793_v44 = vadd.f32 %v2792_v54, %v2710_v20  ;;  %v2618_v31 = vmul.f32 %v4858_v19, %v2305_v48  ;;  %3495 = vrsqrt.f32 %v2434_v33 }
 0x5a2   :  { %v4867_v23 = vpop.xlane.xlu1 %2342  ;;  %3497 = vrsqrt.f32 %v2457_v30 }
 0x5a3   :  { %v2682_v34 = vmul.f32 %v4858_v19, %v2618_v31  ;;  %v4870_v47 = vadd.f32 %v2793_v44, %v2711_v25  ;;  %v2365_v6 = vpop.xlane.xlu0 %2364  ;;  %3499 = vrsqrt.f32 %v2435_v32 }
 0x5a4   :  { %v4872_v55 = vpop.eup %3483  ;;  %v2456_v5 = vmax.f32 %v2365_v6, 1e-24 }
 0x5a5   :  { %v2745_v1 = vadd.f32 %v2744_v8, %v2682_v34  ;;  %v4875_v20 = vpop.eup %3485  ;;  %v2621_v33 = vmul.f32 %v4872_v55, %v2311_v45 }
 0x5a6   :  { %3501 = vrsqrt.f32 %v2456_v5  ;;  %v4877_v54 = vpop.xlane.xlu1 %2346  ;;  %v4879_v24 = vpop.eup %3487  ;;  %v2622_v32 = vmul.f32 %v4875_v20, %v4791_v40 }
 0x5a7   :  { %v2746_v48 = vadd.f32 %v2745_v1, %v2683_v10  ;;  %v2369_v51 = vpop.xlane.xlu0 %2368  ;;  %v2623_v45 = vmul.f32 %v4879_v24, %v4788_v36  ;;  %v2685_v10 = vmul.f32 %v4872_v55, %v2621_v33 }
 0x5a8   :  { %v4882_v25 = vpop.eup %3489  ;;  %v2458_v44 = vmax.f32 %v2369_v51, 1e-24 }
 0x5a9   :  { %v4884_v30 = vpop.eup %3491  ;;  %v2747_v0 = vrot.slane %v2746_v48, 4  ;;  %v2620_v31 = vmul.f32 %v4882_v25, %v2309_v17  ;;  %v2469_v17 = vmax.f32 %v4852_v59, 1e-24 }
 0x5aa   :  { %v4889_v5 = vpop.eup %3493  ;;  %3503 = vrsqrt.f32 %v2458_v44  ;;  %v4891_v8 = vpop.xlane.xlu1 %2344  ;;  %v2624_v40 = vmul.f32 %v4884_v30, %v4811_v46  ;;  %v2686_v44 = vmul.f32 %v4875_v20, %v2622_v32 }
 0x5ab   :  { %v2748_v34 = vadd.f32 %v2747_v0, %v2746_v48  ;;  %v2684_v1 = vmul.f32 %v4882_v25, %v2620_v31  ;;  %v4897_v37 = vpop.xlane.xlu0 %2324  ;;  %v4902_v60 = vpop.eup %3495  ;;  %v2625_v36 = vmul.f32 %v4889_v5, %v4797_v39  ;;  %v2687_v0 = vmul.f32 %v4879_v24, %v2623_v45 }
 0x5ac   :  { %v4905_v18 = vpop.eup %3497  ;;  %v2688_v32 = vmul.f32 %v4884_v30, %v2624_v40  ;;  %3505 = vrsqrt.f32 %v2469_v17 }
 0x5ad   :  { %v2749_v50 = vrot.slane %v2748_v34, 2  ;;  %v2753_v12 = vadd.f32 %v2685_v10, %v2684_v1  ;;  %v4911_v33 = vpop.eup %3499  ;;  %v2626_v10 = vmul.f32 %v4902_v60, %v4827_v42  ;;  %v2649_v35 = vmul.f32 %v4905_v18, %v4856_v3 }
 0x5ae   :  { %v4909_v48 = vpop.xlane.xlu1 %2350 }
 0x5af   :  { %v2750_v46 = vadd.f32 %v2749_v50, %v2748_v34  ;;  %v2754_v31 = vadd.f32 %v2753_v12, %v2686_v44  ;;  %v2389_v62 = vpop.xlane.xlu0 %2388  ;;  %v2689_v50 = vmul.f32 %v4889_v5, %v2625_v36  ;;  %v2627_v12 = vmul.f32 %v4911_v33, %v4818_v28 }
 0x5b0   :  { %v4914_v29 = vpop.eup %3501  ;;  %v2468_v1 = vmax.f32 %v2389_v62, 1e-24  ;;  %v2690_v3 = vmul.f32 %v4902_v60, %v2626_v10  ;;  %v2713_v36 = vmul.f32 %v4905_v18, %v2649_v35 }
 0x5b1   :  { %5618 = vst [vmem:[#allocation66_spill] sm:$0xff] %v4914_v29  ;;  %v2751_v56 = vrot.slane %v2750_v46, 1  ;;  %v2755_v39 = vadd.f32 %v2754_v31, %v2687_v0  ;;  %v2648_v2 = vmul.f32 %v4914_v29, %v2365_v6 }
 0x5b2   :  { %3507 = vrsqrt.f32 %v2468_v1  ;;  %v4926_v42 = vpop.xlane.xlu1 %2348 }
 0x5b3   :  { %v2752_v45 = vadd.f32 %v2751_v56, %v2750_v46  ;;  %v2756_v34 = vadd.f32 %v2755_v39, %v2688_v32  ;;  %v2712_v40 = vmul.f32 %v4914_v29, %v2648_v2  ;;  %v4928_v17 = vpop.xlane.xlu0 %2330  ;;  %v2691_v56 = vmul.f32 %v4911_v33, %v2627_v12 }
 0x5b4   :  { %v4930_v44 = vpop.eup %3503 }
 0x5b5   :  { %5619 = vst [vmem:[#allocation67_spill] sm:$0xff] %v4930_v44  ;;  %v2844_v0 = vmax.f32 %v2752_v45, 1e-24  ;;  %v2757_v6 = vadd.f32 %v2756_v34, %v2689_v50  ;;  %v2795_v31 = vadd.f32 %v4870_v47, %v2712_v40  ;;  %v2650_v28 = vmul.f32 %v4930_v44, %v2369_v51  ;;  %v5621_v40 = vld [vmem:[#allocation21_spill] sm:$0xff] }
 0x5b6   :  { %v4940_v29 = vpop.xlane.xlu1 %2352  ;;  %v4942_v10 = vpop.eup %3505 }
 0x5b7   :  { %3509 = vrsqrt.f32 %v2844_v0  ;;  %v2758_v2 = vadd.f32 %v2757_v6, %v2690_v3  ;;  %v2796_v46 = vadd.f32 %v2795_v31, %v2713_v36  ;;  %v4937_v32 = vpop.xlane.xlu0 %2394  ;;  %v2714_v1 = vmul.f32 %v4930_v44, %v2650_v28  ;;  %v5622_v0 = vld [vmem:[#allocation22_spill] sm:$0xff]  ;;  %v5623_v36 = vld [vmem:[#allocation23_spill] sm:$0xff] }
 0x5b8   :  { %v2661_v45 = vmul.f32 %v4942_v10, %v4852_v59  ;;  %v2549_v3 = vmul.f32 %v4793_v53, %v5621_v40  ;;  %v2548_v6 = vmul.f32 %v4795_v22, %v5622_v0  ;;  %v2551_v31 = vmul.f32 %v4820_v26, %v5623_v36  ;;  %v5625_v59 = vld [vmem:[#allocation25_spill] sm:$0xff] }
 0x5b9   :  { %v2759_v39 = vadd.f32 %v2758_v2, %v2691_v56  ;;  %v4944_v50 = vadd.f32 %v2796_v46, %v2714_v1  ;;  %v5624_v46 = vld [vmem:[#allocation24_spill] sm:$0xff]  ;;  %v2552_v53 = vmul.f32 %v4824_v43, %v4407_v16  ;;  %v2555_v26 = vmul.f32 %v4850_v38, %v4454_v27 }
 0x5ba   :  { %v4959_v56 = vpop.xlane.xlu1 %2374  ;;  %v2550_v1 = vmul.f32 %v4808_v57, %v5624_v46  ;;  %v2725_v0 = vmul.f32 %v4942_v10, %v2661_v45  ;;  %v2437_v27 = vmax.f32 %v4838_v49, 1e-24  ;;  %v2445_v38 = vmax.f32 %v4867_v23, 1e-24 }
 0x5bb   :  { %5620 = vst [vmem:[#allocation68_spill] sm:$0xff] %v4944_v50  ;;  %v2760_v35 = vrot.slane %v2759_v39, 4  ;;  %v4946_v47 = vpop.xlane.xlu0 %2328 }
 0x5bc   :  { %v4948_v51 = vpop.eup %3507  ;;  %3511 = vrsqrt.f32 %v2437_v27  ;;  %v2563_v27 = vmul.f32 %v4911_v33, %v4499_v63 }
 0x5bd   :  { %v2761_v12 = vadd.f32 %v2760_v35, %v2759_v39  ;;  %v2660_v34 = vmul.f32 %v4948_v51, %v2389_v62  ;;  %v2553_v62 = vmul.f32 %v4833_v15, %v5625_v59  ;;  %v2554_v35 = vmul.f32 %v4858_v19, %v4502_v7 }
 0x5be   :  { %3513 = vrsqrt.f32 %v2445_v38 }
 0x5bf   :  { %v2762_v28 = vrot.slane %v2761_v12, 2  ;;  %v4961_v2 = vpop.xlane.xlu0 %2392  ;;  %v2724_v39 = vmul.f32 %v4948_v51, %v2660_v34  ;;  %v2447_v34 = vmax.f32 %v4877_v54, 1e-24 }
 0x5c1   :  { %v3510_v22 = vpop.eup %3509  ;;  %v2763_v40 = vadd.f32 %v2762_v28, %v2761_v12  ;;  %v4978_v19 = vadd.f32 %v2725_v0, %v2724_v39  ;;  %v4981_v12 = vpop.xlane.xlu1 %2378  ;;  %v2448_v28 = vmax.f32 %v4926_v42, 1e-24  ;;  %v2450_v39 = vmax.f32 %v4940_v29, 1e-24 }
 0x5c2   :  { %v2860_v36 = vmul.f32 %v3510_v22, %v2548_v6  ;;  %v2861_v57 = vmul.f32 %v3510_v22, %v2549_v3  ;;  %v2862_v46 = vmul.f32 %v3510_v22, %v2550_v1  ;;  %v2863_v50 = vmul.f32 %v3510_v22, %v2551_v31 }
 0x5c3   :  { %v2864_v15 = vmul.f32 %v3510_v22, %v2552_v53  ;;  %v2865_v59 = vmul.f32 %v3510_v22, %v2553_v62  ;;  %v2866_v44 = vmul.f32 %v3510_v22, %v2554_v35  ;;  %v2867_v16 = vmul.f32 %v3510_v22, %v2555_v26  ;;  %v4975_v43 = vpop.xlane.xlu0 %2334 }
 0x5c4   :  { %2924 = vst [vmem:[#allocation8] sm:$0xff] %v2860_v36  ;;  %2925 = vst [vmem:[#allocation8 + $0x8] sm:$0xff] %v2861_v57  ;;  %v2764_v7 = vrot.slane %v2763_v40, 1  ;;  %v2446_v6 = vmax.f32 %v4891_v8, 1e-24  ;;  %v2559_v0 = vmul.f32 %v4879_v24, %v4403_v21  ;;  %v2558_v36 = vmul.f32 %v4875_v20, %v4425_v58 }
 0x5c5   :  { %2926 = vst [vmem:[#allocation8 + $0x10] sm:$0xff] %v2862_v46  ;;  %2927 = vst [vmem:[#allocation8 + $0x18] sm:$0xff] %v2863_v50  ;;  %v2436_v31 = vmax.f32 %v4897_v37, 1e-24  ;;  %v4990_v1 = vpop.xlane.xlu1 %2376  ;;  %v2439_v53 = vmax.f32 %v4928_v17, 1e-24  ;;  %v2557_v21 = vmul.f32 %v4872_v55, %v4529_v13  ;;  %v2556_v58 = vmul.f32 %v4882_v25, %v4551_v52 }
 0x5c6   :  { %2928 = vst [vmem:[#allocation8 + $0x20] sm:$0xff] %v2864_v15  ;;  %2929 = vst [vmem:[#allocation8 + $0x28] sm:$0xff] %v2865_v59  ;;  %v2765_v45 = vadd.f32 %v2764_v7, %v2763_v40  ;;  %v2471_v22 = vmax.f32 %v4937_v32, 1e-24  ;;  %v2461_v26 = vmax.f32 %v4959_v56, 1e-24  ;;  %v3512_v46 = vpop.eup %3511 }
 0x5c7   :  { %2930 = vst [vmem:[#allocation8 + $0x30] sm:$0xff] %v2866_v44  ;;  %2931 = vst [vmem:[#allocation8 + $0x38] sm:$0xff] %v2867_v16  ;;  %v4984_v3 = vpop.xlane.xlu0 %2398  ;;  %v2449_v44 = vmax.f32 %v4909_v48, 1e-24  ;;  %v2438_v40 = vmax.f32 %v4946_v47, 1e-24  ;;  %v2560_v16 = vmul.f32 %v4884_v30, %v4474_v14  ;;  %v2562_v14 = vmul.f32 %v4902_v60, %v4524_v61 }
 0x5c8   :  { %v2845_v50 = vmax.f32 %v2765_v45, 1e-24  ;;  %v5626_v15 = vld [vmem:[#allocation40_spill] sm:$0xff]  ;;  %v5013_v7 = vpop.eup %3513  ;;  %v2470_v20 = vmax.f32 %v4961_v2, 1e-24  ;;  %v2629_v61 = vmul.f32 %v3512_v46, %v4838_v49 }
 0x5c9   :  { %v5005_v57 = vpop.xlane.xlu1 %2382  ;;  %v2561_v59 = vmul.f32 %v4889_v5, %v5626_v15  ;;  %v2463_v63 = vmax.f32 %v4981_v12, 1e-24  ;;  %v2462_v30 = vmax.f32 %v4990_v1, 1e-24  ;;  %v2441_v60 = vmax.f32 %v4975_v43, 1e-24 }
 0x5ca   :  { %3515 = vrsqrt.f32 %v2845_v50 }
 0x5cb   :  { %3517 = vrsqrt.f32 %v2447_v34  ;;  %v4992_v62 = vpop.xlane.xlu0 %2332 }
 0x5cc   :  { %3519 = vrsqrt.f32 %v2446_v6 }
 0x5cd   :  { %3521 = vrsqrt.f32 %v2436_v31 }
 0x5ce   :  { %3523 = vrsqrt.f32 %v2449_v44  ;;  %v5034_v44 = vpop.xlane.xlu1 %2380 }
 0x5cf   :  { %3525 = vrsqrt.f32 %v2448_v28  ;;  %v4998_v35 = vpop.xlane.xlu0 %2396 }
 0x5d0   :  { %3527 = vrsqrt.f32 %v2439_v53 }
 0x5d1   :  { %3529 = vrsqrt.f32 %v2450_v39  ;;  %v2440_v39 = vmax.f32 %v4992_v62, 1e-24 }
 0x5d2   :  { %3531 = vrsqrt.f32 %v2471_v22  ;;  %v5627_v22 = vld [vmem:[#allocation35_spill] sm:$0xff] }
 0x5d3   :  { %3533 = vrsqrt.f32 %v2461_v26  ;;  %v5020_v24 = vpop.xlane.xlu0 %2336  ;;  %v5045_v26 = vmul.f32 %v4799_v9, %v5627_v22  ;;  %v5645_v22 = vld [vmem:[#allocation56_spill] sm:$0xff] }
 0x5d4   :  { %v3516_v5 = vpop.eup %3515  ;;  %3535 = vrsqrt.f32 %v2438_v40  ;;  %v5629_v40 = vld [vmem:[#allocation36_spill] sm:$0xff] }
 0x5d5   :  { %v5026_v33 = vpop.eup %3517  ;;  %v2868_v13 = vmul.f32 %v3516_v5, %v2556_v58  ;;  %v2869_v55 = vmul.f32 %v3516_v5, %v2557_v21  ;;  %v2870_v38 = vmul.f32 %v3516_v5, %v2558_v36  ;;  %v2871_v52 = vmul.f32 %v3516_v5, %v2559_v0  ;;  %5628 = vst [vmem:[#allocation21_spill] sm:$0xff] %v5045_v26  ;;  %v5635_v58 = vld [vmem:[#allocation51_spill] sm:$0xff] }
 0x5d6   :  { %v5028_v25 = vpop.eup %3519  ;;  %v2872_v45 = vmul.f32 %v3516_v5, %v2560_v16  ;;  %v2873_v34 = vmul.f32 %v3516_v5, %v2561_v59  ;;  %v2874_v50 = vmul.f32 %v3516_v5, %v2562_v14  ;;  %v2875_v6 = vmul.f32 %v3516_v5, %v2563_v27  ;;  %v5631_v59 = vld [vmem:[#allocation39_spill] sm:$0xff] }
 0x5d7   :  { %v5030_v31 = vpop.eup %3521  ;;  %2932 = vst [vmem:[#allocation8 + $0x40] sm:$0xff] %v2868_v13  ;;  %2933 = vst [vmem:[#allocation8 + $0x48] sm:$0xff] %v2869_v55  ;;  %3537 = vrsqrt.f32 %v2470_v20  ;;  %v5036_v28 = vpop.xlane.xlu0 %2400  ;;  %v5049_v0 = vmul.f32 %v4804_v4, %v5629_v40  ;;  %v2465_v36 = vmax.f32 %v5005_v57, 1e-24  ;;  %v5056_v16 = vmul.f32 %v4836_v41, %v5631_v59  ;;  %v5633_v27 = vld [vmem:[#allocation43_spill] sm:$0xff]  ;;  %v5637_v13 = vld [vmem:[#allocation53_spill] sm:$0xff] }
 0x5d8   :  { %2934 = vst [vmem:[#allocation8 + $0x50] sm:$0xff] %v2870_v38  ;;  %2935 = vst [vmem:[#allocation8 + $0x58] sm:$0xff] %v2871_v52  ;;  %v5038_v53 = vpop.eup %3523  ;;  %3539 = vrsqrt.f32 %v2463_v63  ;;  %v5060_v21 = vmul.f32 %v4843_v11, %v5633_v27  ;;  %v5063_v9 = vmul.f32 %v3512_v46, %v5635_v58  ;;  %v2693_v4 = vmul.f32 %v3512_v46, %v2629_v61  ;;  %v5639_v38 = vld [vmem:[#allocation52_spill] sm:$0xff]  ;;  %v5642_v61 = vld [vmem:[#allocation55_spill] sm:$0xff] }
 0x5d9   :  { %2936 = vst [vmem:[#allocation8 + $0x60] sm:$0xff] %v2872_v45  ;;  %2937 = vst [vmem:[#allocation8 + $0x68] sm:$0xff] %v2873_v34  ;;  %v5041_v49 = vpop.eup %3525  ;;  %3541 = vrsqrt.f32 %v2462_v30  ;;  %v2637_v5 = vmul.f32 %v5013_v7, %v4867_v23  ;;  %v2473_v14 = vmax.f32 %v4984_v3, 1e-24  ;;  %v5076_v11 = vmul.f32 %v4942_v10, %v5637_v13  ;;  %v5088_v45 = vpop.xlane.xlu1 %2384  ;;  %v5647_v27 = vld [vmem:[#allocation57_spill] sm:$0xff]  ;;  %v5648_v58 = vld [vmem:[#allocation67_spill] sm:$0xff] }
 0x5da   :  { %2938 = vst [vmem:[#allocation8 + $0x70] sm:$0xff] %v2874_v50  ;;  %2939 = vst [vmem:[#allocation8 + $0x78] sm:$0xff] %v2875_v6  ;;  %v5052_v15 = vpop.eup %3527  ;;  %3543 = vrsqrt.f32 %v2441_v60  ;;  %v2464_v55 = vmax.f32 %v5034_v44, 1e-24  ;;  %v5084_v23 = vmul.f32 %v4905_v18, %v5639_v38  ;;  %v2628_v52 = vmul.f32 %v5030_v31, %v4897_v37  ;;  %v5641_v50 = vld [vmem:[#allocation54_spill] sm:$0xff] }
 0x5db   :  { %5630 = vst [vmem:[#allocation22_spill] sm:$0xff] %v5049_v0  ;;  %5632 = vst [vmem:[#allocation23_spill] sm:$0xff] %v5056_v16  ;;  %v5065_v20 = vpop.eup %3529  ;;  %v5070_v63 = vpop.xlane.xlu0 %2340  ;;  %3545 = vrsqrt.f32 %v2440_v39  ;;  %v2472_v10 = vmax.f32 %v4998_v35, 1e-24  ;;  %v5095_v6 = vmul.f32 %v5013_v7, %v5641_v50  ;;  %v5643_v60 = vld [vmem:[#allocation66_spill] sm:$0xff]  ;;  %v2639_v18 = vmul.f32 %v5026_v33, %v4877_v54 }
 0x5dc   :  { %5634 = vst [vmem:[#allocation24_spill] sm:$0xff] %v5060_v21  ;;  %5636 = vst [vmem:[#allocation25_spill] sm:$0xff] %v5063_v9  ;;  %v5072_v41 = vpop.eup %3531  ;;  %v2444_v30 = vmax.f32 %v5070_v63, 1e-24  ;;  %3547 = vrsqrt.f32 %v2465_v36  ;;  %v5099_v39 = vmul.f32 %v5643_v60, %v5642_v61  ;;  %v5104_v37 = vmul.f32 %v5013_v7, %v2637_v5 }
 0x5dd   :  { %5638 = vst [vmem:[#allocation40_spill] sm:$0xff] %v5076_v11  ;;  %v5080_v46 = vpop.eup %3533  ;;  %5640 = vst [vmem:[#allocation35_spill] sm:$0xff] %v5084_v23  ;;  %v5108_v40 = vmul.f32 %v5026_v33, %v5645_v22  ;;  %v2442_v36 = vmax.f32 %v5020_v24, 1e-24  ;;  %v5115_v13 = vmul.f32 %v5648_v58, %v5647_v27  ;;  %v2638_v54 = vmul.f32 %v5028_v25, %v4891_v8 }
 0x5de   :  { %v5091_v34 = vpop.eup %3535  ;;  %5644 = vst [vmem:[#allocation36_spill] sm:$0xff] %v5099_v39  ;;  %3549 = vrsqrt.f32 %v2444_v30  ;;  %v2692_v30 = vmul.f32 %v5030_v31, %v2628_v52  ;;  %v2640_v38 = vmul.f32 %v5041_v49, %v4926_v42  ;;  %v5130_v61 = vmul.f32 %v5026_v33, %v2639_v18  ;;  %v5650_v18 = vld [vmem:[#allocation58_spill] sm:$0xff] }
 0x5df   :  { %5646 = vst [vmem:[#allocation39_spill] sm:$0xff] %v5108_v40  ;;  %3551 = vrsqrt.f32 %v2473_v14  ;;  %v5111_v59 = vpop.xlane.xlu0 %2372  ;;  %5649 = vst [vmem:[#allocation43_spill] sm:$0xff] %v5115_v13  ;;  %v2641_v14 = vmul.f32 %v5038_v53, %v4909_v48  ;;  %v2630_v8 = vmul.f32 %v5091_v34, %v4946_v47  ;;  %v2631_v48 = vmul.f32 %v5052_v15, %v4928_v17 }
 0x5e0   :  { %3553 = vrsqrt.f32 %v2464_v55  ;;  %v2460_v7 = vmax.f32 %v5111_v59, 1e-24  ;;  %v2466_v55 = vmax.f32 %v5088_v45, 1e-24  ;;  %v2642_v42 = vmul.f32 %v5065_v20, %v4940_v29 }
 0x5e1   :  { %v5120_v5 = vpop.eup %3537  ;;  %3555 = vrsqrt.f32 %v2472_v10  ;;  %v2474_v52 = vmax.f32 %v5036_v28, 1e-24  ;;  %v5148_v47 = vmul.f32 %v5028_v25, %v5650_v18  ;;  %v2663_v22 = vmul.f32 %v5072_v41, %v4937_v32 }
 0x5e2   :  { %v5127_v50 = vpop.xlane.xlu1 %2406  ;;  %3557 = vrsqrt.f32 %v2460_v7  ;;  %v5135_v60 = vpop.eup %3539  ;;  %v2653_v17 = vmul.f32 %v5080_v46, %v4959_v56  ;;  %v2662_v29 = vmul.f32 %v5120_v5, %v4961_v2  ;;  %v2702_v27 = vmul.f32 %v5028_v25, %v2638_v54 }
 0x5e3   :  { %3559 = vrsqrt.f32 %v2442_v36  ;;  %v5142_v10 = vpop.xlane.xlu0 %2404  ;;  %v5144_v33 = vpop.eup %3541  ;;  %5651 = vst [vmem:[#allocation51_spill] sm:$0xff] %v5148_v47  ;;  %v2766_v58 = vadd.f32 %v2693_v4, %v2692_v30  ;;  %v5160_v7 = vmul.f32 %v5038_v53, %v2641_v14  ;;  %v5163_v18 = vmul.f32 %v5041_v49, %v2640_v38 }
 0x5e4   :  { %v5156_v36 = vpop.eup %3543  ;;  %v2694_v56 = vmul.f32 %v5091_v34, %v2630_v8  ;;  %3561 = vrsqrt.f32 %v2466_v55  ;;  %v2477_v2 = vmax.f32 %v5127_v50, 1e-24  ;;  %v2695_v25 = vmul.f32 %v5052_v15, %v2631_v48 }
 0x5e5   :  { %v5167_v32 = vpop.eup %3545  ;;  %v5176_v4 = vmul.f32 %v5065_v20, %v2642_v42  ;;  %v2655_v54 = vmul.f32 %v5135_v60, %v4981_v12  ;;  %3563 = vrsqrt.f32 %v2474_v52  ;;  %v2727_v38 = vmul.f32 %v5072_v41, %v2663_v22 }
 0x5e6   :  { %v5165_v11 = vpop.xlane.xlu1 %2354  ;;  %v5172_v23 = vpop.eup %3547  ;;  %v2717_v8 = vmul.f32 %v5080_v46, %v2653_v17  ;;  %v2726_v55 = vmul.f32 %v5120_v5, %v2662_v29  ;;  %v2632_v48 = vmul.f32 %v5167_v32, %v4992_v62  ;;  %v2476_v42 = vmax.f32 %v5142_v10, 1e-24 }
 0x5e7   :  { %v2451_v13 = vmax.f32 %v5165_v11, 1e-24  ;;  %v5180_v30 = vpop.xlane.xlu0 %2338  ;;  %v2767_v17 = vadd.f32 %v2766_v58, %v2694_v56  ;;  %v2719_v62 = vmul.f32 %v5135_v60, %v2655_v54 }
 0x5e8   :  { %v5182_v14 = vpop.eup %3549  ;;  %v2443_v52 = vmax.f32 %v5180_v30, 1e-24  ;;  %v2819_v58 = vadd.f32 %v4978_v19, %v2726_v55  ;;  %v2696_v54 = vmul.f32 %v5167_v32, %v2632_v48 }
 0x5e9   :  { %3565 = vrsqrt.f32 %v2451_v13  ;;  %v5187_v39 = vpop.eup %3551  ;;  %v2636_v12 = vmul.f32 %v5182_v14, %v5070_v63  ;;  %v2654_v13 = vmul.f32 %v5144_v33, %v4990_v1  ;;  %v2633_v63 = vmul.f32 %v5156_v36, %v4975_v43 }
 0x5ea   :  { %v5195_v16 = vpop.xlane.xlu1 %2386  ;;  %v5197_v22 = vpop.eup %3553  ;;  %3567 = vrsqrt.f32 %v2477_v2  ;;  %v2657_v1 = vmul.f32 %v5172_v23, %v5005_v57  ;;  %v2768_v55 = vadd.f32 %v2767_v17, %v2695_v25  ;;  %v2665_v48 = vmul.f32 %v5187_v39, %v4984_v3 }
 0x5eb   :  { %v2467_v29 = vmax.f32 %v5195_v16, 1e-24  ;;  %v5202_v21 = vpop.eup %3555  ;;  %v2700_v26 = vmul.f32 %v5182_v14, %v2636_v12  ;;  %3569 = vrsqrt.f32 %v2443_v52  ;;  %v5208_v0 = vpop.xlane.xlu0 %2370  ;;  %v2718_v19 = vmul.f32 %v5144_v33, %v2654_v13 }
 0x5ec   :  { %v5210_v9 = vpop.eup %3557  ;;  %v2459_v56 = vmax.f32 %v5208_v0, 1e-24  ;;  %v2664_v57 = vmul.f32 %v5202_v21, %v4998_v35  ;;  %v2820_v25 = vadd.f32 %v2819_v58, %v2727_v38  ;;  %v2721_v3 = vmul.f32 %v5172_v23, %v2657_v1 }
 0x5ed   :  { %3571 = vrsqrt.f32 %v2467_v29  ;;  %v5216_v2 = vpop.eup %3559  ;;  %v2779_v43 = vadd.f32 %v5104_v37, %v2700_v26  ;;  %v2652_v12 = vmul.f32 %v5210_v9, %v5111_v59  ;;  %v2697_v29 = vmul.f32 %v5156_v36, %v2633_v63 }
 0x5ee   :  { %3573 = vrsqrt.f32 %v2476_v42  ;;  %v5222_v52 = vpop.xlane.xlu1 %2410  ;;  %v5233_v59 = vpop.eup %3561  ;;  %v2656_v42 = vmul.f32 %v5197_v22, %v5034_v44  ;;  %v2634_v35 = vmul.f32 %v5216_v2, %v5020_v24  ;;  %v2728_v44 = vmul.f32 %v5202_v21, %v2664_v57 }
 0x5ef   :  { %3575 = vrsqrt.f32 %v2459_v56  ;;  %v2780_v40 = vadd.f32 %v2779_v43, %v2702_v27  ;;  %v2716_v26 = vmul.f32 %v5210_v9, %v2652_v12  ;;  %v5231_v37 = vpop.xlane.xlu0 %2402  ;;  %v5240_v13 = vpop.eup %3563  ;;  %v2769_v27 = vadd.f32 %v2768_v55, %v2696_v54 }
 0x5f0   :  { %v2475_v17 = vmax.f32 %v5231_v37, 1e-24  ;;  %v2479_v38 = vmax.f32 %v5222_v52, 1e-24  ;;  %v2729_v58 = vmul.f32 %v5187_v39, %v2665_v48  ;;  %v2698_v54 = vmul.f32 %v5216_v2, %v2634_v35 }
 0x5f1   :  { %v2781_v63 = vadd.f32 %v2780_v40, %v5130_v61  ;;  %v2805_v56 = vadd.f32 %v2717_v8, %v2716_v26  ;;  %v2658_v8 = vmul.f32 %v5233_v59, %v5088_v45  ;;  %v2666_v55 = vmul.f32 %v5240_v13, %v5036_v28 }
 0x5f2   :  { %v5244_v43 = vpop.xlane.xlu1 %2408  ;;  %3577 = vrsqrt.f32 %v2475_v17  ;;  %v2821_v45 = vadd.f32 %v2820_v25, %v2728_v44 }
 0x5f3   :  { %v5246_v12 = vpop.eup %3565  ;;  %v2478_v24 = vmax.f32 %v5244_v43, 1e-24  ;;  %v2806_v47 = vadd.f32 %v2805_v56, %v2718_v19  ;;  %v2782_v40 = vadd.f32 %v2781_v63, %v5163_v18  ;;  %v2720_v19 = vmul.f32 %v5197_v22, %v2656_v42 }
 0x5f4   :  { %v2643_v1 = vmul.f32 %v5246_v12, %v5165_v11  ;;  %v5255_v61 = vpop.eup %3567  ;;  %v2770_v63 = vadd.f32 %v2769_v27, %v2697_v29  ;;  %v2730_v29 = vmul.f32 %v5240_v13, %v2666_v55 }
 0x5f5   :  { %3579 = vrsqrt.f32 %v2478_v24  ;;  %v5262_v57 = vpop.eup %3569  ;;  %v2807_v48 = vadd.f32 %v2806_v47, %v2719_v62  ;;  %v2783_v18 = vadd.f32 %v2782_v40, %v5160_v7  ;;  %v2722_v24 = vmul.f32 %v5233_v59, %v2658_v8 }
 0x5f6   :  { %v2707_v11 = vmul.f32 %v5246_v12, %v2643_v1  ;;  %v5267_v26 = vpop.xlane.xlu1 %2414  ;;  %v2635_v35 = vmul.f32 %v5262_v57, %v5180_v30  ;;  %3581 = vrsqrt.f32 %v2479_v38  ;;  %v2771_v25 = vadd.f32 %v2770_v63, %v2698_v54 }
 0x5f7   :  { %v5269_v17 = vpop.eup %3571  ;;  %v2784_v56 = vadd.f32 %v2783_v18, %v5176_v4  ;;  %v2808_v62 = vadd.f32 %v2807_v48, %v2720_v19  ;;  %v2481_v7 = vmax.f32 %v5267_v26, 1e-24  ;;  %v2669_v27 = vmul.f32 %v5255_v61, %v5127_v50 }
 0x5f8   :  { %v5273_v28 = vpop.eup %3573  ;;  %v2659_v47 = vmul.f32 %v5269_v17, %v5195_v16  ;;  %v2699_v30 = vmul.f32 %v5262_v57, %v2635_v35  ;;  %v2822_v1 = vadd.f32 %v2821_v45, %v2729_v58 }
 0x5f9   :  { %5652 = vst [vmem:[#allocation53_spill] sm:$0xff] %v5273_v28  ;;  %v5279_v42 = vpop.eup %3575  ;;  %v2785_v44 = vadd.f32 %v2784_v56, %v2707_v11  ;;  %v2809_v38 = vadd.f32 %v2808_v62, %v2721_v3  ;;  %v2668_v54 = vmul.f32 %v5273_v28, %v5142_v10  ;;  %3583 = vrsqrt.f32 %v2481_v7  ;;  %v5653_v11 = vld [vmem:[#allocation59_spill] sm:$0xff]  ;;  %v5654_v62 = vld [vmem:[#allocation68_spill] sm:$0xff] }
 0x5fa   :  { %v2723_v4 = vmul.f32 %v5269_v17, %v2659_v47  ;;  %v5287_v16 = vpop.xlane.xlu1 %2412  ;;  %v2772_v40 = vadd.f32 %v2771_v25, %v2699_v30  ;;  %v2651_v19 = vmul.f32 %v5279_v42, %v5208_v0  ;;  %v5298_v3 = vmul.f32 %v5030_v31, %v5653_v11 }
 0x5fb   :  { %v2480_v8 = vmax.f32 %v5287_v16, 1e-24  ;;  %v2786_v55 = vrot.slane %v2785_v44, 4  ;;  %v2810_v48 = vadd.f32 %v2809_v38, %v2722_v24  ;;  %v2823_v45 = vadd.f32 %v2822_v1, %v2730_v29 }
 0x5fc   :  { %v5294_v50 = vpop.eup %3577  ;;  %v2773_v18 = vrot.slane %v2772_v40, 4  ;;  %v2715_v58 = vmul.f32 %v5279_v42, %v2651_v19  ;;  %v2733_v0 = vmul.f32 %v5255_v61, %v2669_v27  ;;  %v2732_v25 = vmul.f32 %v5273_v28, %v2668_v54 }
 0x5fd   :  { %3585 = vrsqrt.f32 %v2480_v8  ;;  %v2787_v63 = vadd.f32 %v2786_v55, %v2785_v44  ;;  %v2811_v35 = vadd.f32 %v2810_v48, %v2723_v4  ;;  %v2667_v24 = vmul.f32 %v5294_v50, %v5231_v37 }
 0x5fe   :  { %v2417_v56 = vpop.xlane.xlu1 %2416  ;;  %v2774_v47 = vadd.f32 %v2773_v18, %v2772_v40  ;;  %v2798_v7 = vadd.f32 %v5654_v62, %v2715_v58  ;;  %v5655_v40 = vld [vmem:[#allocation37_spill] sm:$0xff]  ;;  %v2831_v58 = vadd.f32 %v2733_v0, %v2732_v25  ;;  %v5657_v0 = vld [vmem:[#allocation16_spill] sm:$0xff] }
 0x5ff   :  { %v5302_v10 = vpop.eup %3579  ;;  %v2482_v31 = vmax.f32 %v2417_v56, 1e-24  ;;  %v2788_v30 = vrot.slane %v2787_v63, 2  ;;  %v2812_v38 = vrot.slane %v2811_v35, 4  ;;  %v2731_v1 = vmul.f32 %v5294_v50, %v2667_v24 }
 0x600   :  { %v2670_v29 = vmul.f32 %v5302_v10, %v5244_v43  ;;  %v5310_v27 = vpop.eup %3581  ;;  %v2775_v44 = vrot.slane %v2774_v47, 2  ;;  %v2799_v4 = vrot.slane %v2798_v7, 4  ;;  %v5315_v19 = vmul.f32 %v5038_v53, %v5655_v40 }
 0x601   :  { %3587 = vrsqrt.f32 %v2482_v31  ;;  %v2789_v37 = vadd.f32 %v2788_v30, %v2787_v63  ;;  %v2813_v8 = vadd.f32 %v2812_v38, %v2811_v35  ;;  %v2824_v43 = vadd.f32 %v2823_v45, %v2731_v1  ;;  %v5656_v31 = vld [vmem:[#allocation60_spill] sm:$0xff] }
 0x602   :  { %v2734_v54 = vmul.f32 %v5302_v10, %v2670_v29  ;;  %v5318_v55 = vpop.xlane.xlu1 %2418  ;;  %v2776_v48 = vadd.f32 %v2775_v44, %v2774_v47  ;;  %v2800_v11 = vadd.f32 %v2799_v4, %v2798_v7  ;;  %v2671_v24 = vmul.f32 %v5310_v27, %v5222_v52 }
 0x603   :  { %v2483_v18 = vmax.f32 %v5318_v55, 1e-24  ;;  %v2790_v62 = vrot.slane %v2789_v37, 1  ;;  %v2814_v28 = vrot.slane %v2813_v8, 2  ;;  %v5325_v53 = vmul.f32 %v4948_v51, %v5656_v31  ;;  %v5327_v38 = vpop.eup %3583 }
 0x604   :  { %v2777_v63 = vrot.slane %v2776_v48, 1  ;;  %v2801_v35 = vrot.slane %v2800_v11, 2  ;;  %v2825_v30 = vrot.slane %v2824_v43, 4  ;;  %v2832_v45 = vadd.f32 %v2831_v58, %v2734_v54 }
 0x605   :  { %v2791_v47 = vadd.f32 %v2790_v62, %v2789_v37  ;;  %v2815_v7 = vadd.f32 %v2814_v28, %v2813_v8  ;;  %3589 = vrsqrt.f32 %v2483_v18  ;;  %v5333_v25 = vmul.f32 %v5041_v49, %v5657_v0 }
 0x606   :  { %v2778_v52 = vadd.f32 %v2777_v63, %v2776_v48  ;;  %v2802_v44 = vadd.f32 %v2801_v35, %v2800_v11  ;;  %v2826_v4 = vadd.f32 %v2825_v30, %v2824_v43  ;;  %v2735_v40 = vmul.f32 %v5310_v27, %v2671_v24  ;;  %v5658_v43 = vld [vmem:[#allocation18_spill] sm:$0xff] }
 0x607   :  { %v5329_v29 = vpop.eup %3585  ;;  %v2847_v51 = vmax.f32 %v2791_v47, 1e-24  ;;  %v2816_v1 = vrot.slane %v2815_v7, 1  ;;  %v2673_v54 = vmul.f32 %v5327_v38, %v5267_v26  ;;  %v2567_v58 = vmul.f32 %v5052_v15, %v5658_v43  ;;  %v5660_v47 = vld [vmem:[#allocation17_spill] sm:$0xff] }
 0x608   :  { %v2672_v31 = vmul.f32 %v5329_v29, %v5287_v16  ;;  %v2846_v37 = vmax.f32 %v2778_v52, 1e-24  ;;  %v2803_v28 = vrot.slane %v2802_v44, 1  ;;  %v2827_v8 = vrot.slane %v2826_v4, 2  ;;  %v5659_v16 = vld [vmem:[#allocation26_spill] sm:$0xff] }
 0x609   :  { %3591 = vrsqrt.f32 %v2847_v51  ;;  %v2817_v18 = vadd.f32 %v2816_v1, %v2815_v7  ;;  %v2833_v48 = vadd.f32 %v2832_v45, %v2735_v40  ;;  %v2578_v63 = vmul.f32 %v5065_v20, %v5659_v16  ;;  %v5661_v45 = vld [vmem:[#allocation41_spill] sm:$0xff]  ;;  %v5662_v51 = vld [vmem:[#allocation12_spill] sm:$0xff]  ;;  %v5664_v1 = vld [vmem:[#allocation27_spill] sm:$0xff] }
 0x60a   :  { %v2736_v49 = vmul.f32 %v5329_v29, %v2672_v31  ;;  %3593 = vrsqrt.f32 %v2846_v37  ;;  %v2804_v62 = vadd.f32 %v2803_v28, %v2802_v44  ;;  %v2828_v24 = vadd.f32 %v2827_v8, %v2826_v4  ;;  %v5663_v4 = vld [vmem:[#allocation44_spill] sm:$0xff]  ;;  %v5665_v40 = vld [vmem:[#allocation45_spill] sm:$0xff]  ;;  %v5666_v28 = vld [vmem:[#allocation19_spill] sm:$0xff] }
 0x60b   :  { %v5341_v11 = vpop.eup %3587  ;;  %v2849_v35 = vmax.f32 %v2817_v18, 1e-24  ;;  %v5350_v7 = vmul.f32 %v5072_v41, %v5660_v47  ;;  %v5354_v0 = vmul.f32 %v5080_v46, %v5661_v45  ;;  %v2566_v44 = vmul.f32 %v5091_v34, %v5662_v51  ;;  %v5667_v8 = vld [vmem:[#allocation46_spill] sm:$0xff]  ;;  %v5677_v51 = vld [vmem:[#allocation49_spill] sm:$0xff] }
 0x60c   :  { %v2834_v30 = vadd.f32 %v2833_v48, %v2736_v49  ;;  %v2674_v26 = vmul.f32 %v5341_v11, %v2417_v56  ;;  %v2848_v52 = vmax.f32 %v2804_v62, 1e-24  ;;  %v2829_v15 = vrot.slane %v2828_v24, 1  ;;  %v5668_v49 = vld [vmem:[#allocation28_spill] sm:$0xff]  ;;  %v5669_v48 = vld [vmem:[#allocation47_spill] sm:$0xff]  ;;  %v5671_v16 = vld [vmem:[#allocation50_spill] sm:$0xff] }
 0x60d   :  { %v5360_v20 = vmul.f32 %v5135_v60, %v5663_v4  ;;  %3595 = vrsqrt.f32 %v2849_v35  ;;  %v2737_v56 = vmul.f32 %v5327_v38, %v2673_v54  ;;  %v5365_v41 = vmul.f32 %v5120_v5, %v5664_v1  ;;  %v5672_v35 = vld [vmem:[#allocation14_spill] sm:$0xff]  ;;  %v5678_v4 = vld [vmem:[#allocation48_spill] sm:$0xff] }
 0x60e   :  { %v2590_v46 = vmul.f32 %v5144_v33, %v5665_v40  ;;  %3597 = vrsqrt.f32 %v2848_v52  ;;  %v2830_v31 = vadd.f32 %v2829_v15, %v2828_v24  ;;  %v2569_v34 = vmul.f32 %v5156_v36, %v5666_v28  ;;  %v5670_v24 = vld [vmem:[#allocation13_spill] sm:$0xff]  ;;  %v5674_v47 = vld [vmem:[#allocation42_spill] sm:$0xff]  ;;  %v5676_v15 = vld [vmem:[#allocation20_spill] sm:$0xff] }
 0x60f   :  { %v5369_v37 = vpop.eup %3589  ;;  %v2593_v60 = vmul.f32 %v5172_v23, %v5667_v8  ;;  %v2738_v18 = vmul.f32 %v5341_v11, %v2674_v26  ;;  %v2835_v54 = vadd.f32 %v2834_v30, %v2737_v56  ;;  %v5378_v5 = vmul.f32 %v5187_v39, %v5668_v49  ;;  %v5673_v26 = vld [vmem:[#allocation15_spill] sm:$0xff] }
 0x610   :  { %v2592_v33 = vmul.f32 %v5197_v22, %v5669_v48  ;;  %v2850_v43 = vmax.f32 %v2830_v31, 1e-24  ;;  %v2675_v62 = vmul.f32 %v5369_v37, %v5318_v55  ;;  %v2568_v36 = vmul.f32 %v5167_v32, %v5670_v24  ;;  %v5675_v22 = vld [vmem:[#allocation38_spill] sm:$0xff]  ;;  %v5679_v40 = vld [vmem:[#allocation51_spill] sm:$0xff] }
 0x611   :  { %v2594_v23 = vmul.f32 %v5233_v59, %v5671_v16  ;;  %v2570_v30 = vmul.f32 %v5216_v2, %v5672_v35  ;;  %v2572_v39 = vmul.f32 %v5182_v14, %v5673_v26  ;;  %v2588_v45 = vmul.f32 %v5210_v9, %v5674_v47 }
 0x612   :  { %v2579_v52 = vmul.f32 %v5246_v12, %v5675_v22  ;;  %v2571_v55 = vmul.f32 %v5262_v57, %v5676_v15  ;;  %3599 = vrsqrt.f32 %v2850_v43  ;;  %v2595_v59 = vmul.f32 %v5269_v17, %v5677_v51  ;;  %v5680_v57 = vld [vmem:[#allocation39_spill] sm:$0xff] }
 0x613   :  { %v3592_v32 = vpop.eup %3591  ;;  %v2587_v2 = vmul.f32 %v5279_v42, %v5678_v4  ;;  %v5402_v56 = vadd.f32 %v2835_v54, %v2738_v18  ;;  %v5405_v14 = vmul.f32 %v5369_v37, %v2675_v62  ;;  %v5681_v18 = vld [vmem:[#allocation25_spill] sm:$0xff] }
 0x614   :  { %v3594_v9 = vpop.eup %3593  ;;  %v2884_v1 = vmul.f32 %v3592_v32, %v2572_v39  ;;  %v2885_v12 = vmul.f32 %v3592_v32, %v5095_v6  ;;  %v2886_v31 = vmul.f32 %v3592_v32, %v5679_v40  ;;  %v2887_v28 = vmul.f32 %v3592_v32, %v5680_v57  ;;  %v5682_v39 = vld [vmem:[#allocation22_spill] sm:$0xff]  ;;  %v5689_v4 = vld [vmem:[#allocation29_spill] sm:$0xff] }
 0x615   :  { %v2888_v8 = vmul.f32 %v3592_v32, %v5333_v25  ;;  %v2889_v17 = vmul.f32 %v3592_v32, %v5315_v19  ;;  %v2890_v49 = vmul.f32 %v3592_v32, %v2578_v63  ;;  %v2891_v48 = vmul.f32 %v3592_v32, %v2579_v52  ;;  %v5685_v52 = vld [vmem:[#allocation23_spill] sm:$0xff]  ;;  %v5691_v40 = vld [vmem:[#allocation61_spill] sm:$0xff] }
 0x616   :  { %2948 = vst [vmem:[#allocation8 + $0xc0] sm:$0xff] %v2884_v1  ;;  %2949 = vst [vmem:[#allocation8 + $0xc8] sm:$0xff] %v2885_v12  ;;  %v2876_v42 = vmul.f32 %v3594_v9, %v5298_v3  ;;  %v2877_v54 = vmul.f32 %v3594_v9, %v5681_v18  ;;  %v2878_v43 = vmul.f32 %v3594_v9, %v2566_v44  ;;  %v5690_v1 = vld [vmem:[#allocation31_spill] sm:$0xff] }
 0x617   :  { %2950 = vst [vmem:[#allocation8 + $0xd0] sm:$0xff] %v2886_v31  ;;  %2951 = vst [vmem:[#allocation8 + $0xd8] sm:$0xff] %v2887_v28  ;;  %v2879_v6 = vmul.f32 %v3594_v9, %v2567_v58  ;;  %v3596_v62 = vpop.eup %3595  ;;  %v2880_v25 = vmul.f32 %v3594_v9, %v2568_v36  ;;  %v2881_v24 = vmul.f32 %v3594_v9, %v2569_v34 }
 0x618   :  { %2952 = vst [vmem:[#allocation8 + $0xe0] sm:$0xff] %v2888_v8  ;;  %2953 = vst [vmem:[#allocation8 + $0xe8] sm:$0xff] %v2889_v17  ;;  %v2882_v19 = vmul.f32 %v3594_v9, %v2570_v30  ;;  %v2883_v63 = vmul.f32 %v3594_v9, %v2571_v55  ;;  %v3598_v16 = vpop.eup %3597  ;;  %v2900_v35 = vmul.f32 %v3596_v62, %v2588_v45  ;;  %v5683_v45 = vld [vmem:[#allocation21_spill] sm:$0xff]  ;;  %v5688_v55 = vld [vmem:[#allocation43_spill] sm:$0xff] }
 0x619   :  { %2954 = vst [vmem:[#allocation8 + $0xf0] sm:$0xff] %v2890_v49  ;;  %2955 = vst [vmem:[#allocation8 + $0xf8] sm:$0xff] %v2891_v48  ;;  %v2901_v3 = vmul.f32 %v3596_v62, %v5354_v0  ;;  %v2902_v26 = vmul.f32 %v3596_v62, %v2590_v46  ;;  %v2903_v58 = vmul.f32 %v3596_v62, %v5360_v20  ;;  %v5684_v0 = vld [vmem:[#allocation24_spill] sm:$0xff] }
 0x61a   :  { %2940 = vst [vmem:[#allocation8 + $0x80] sm:$0xff] %v2876_v42  ;;  %2941 = vst [vmem:[#allocation8 + $0x88] sm:$0xff] %v2877_v54  ;;  %v2904_v44 = vmul.f32 %v3596_v62, %v2592_v33  ;;  %v2905_v36 = vmul.f32 %v3596_v62, %v2593_v60  ;;  %v2906_v34 = vmul.f32 %v3596_v62, %v2594_v23  ;;  %v5686_v33 = vld [vmem:[#allocation36_spill] sm:$0xff]  ;;  %v5687_v23 = vld [vmem:[#allocation35_spill] sm:$0xff] }
 0x61b   :  { %2942 = vst [vmem:[#allocation8 + $0x90] sm:$0xff] %v2878_v43  ;;  %2943 = vst [vmem:[#allocation8 + $0x98] sm:$0xff] %v2879_v6  ;;  %v2907_v30 = vmul.f32 %v3596_v62, %v2595_v59  ;;  %v2892_v47 = vmul.f32 %v3598_v16, %v5682_v39  ;;  %v2893_v22 = vmul.f32 %v3598_v16, %v5683_v45  ;;  %v5693_v54 = vld [vmem:[#allocation33_spill] sm:$0xff]  ;;  %v5694_v43 = vld [vmem:[#allocation32_spill] sm:$0xff] }
 0x61c   :  { %2944 = vst [vmem:[#allocation8 + $0xa0] sm:$0xff] %v2880_v25  ;;  %2945 = vst [vmem:[#allocation8 + $0xa8] sm:$0xff] %v2881_v24  ;;  %v2894_v46 = vmul.f32 %v3598_v16, %v5684_v0  ;;  %v2895_v20 = vmul.f32 %v3598_v16, %v5685_v52  ;;  %v2896_v60 = vmul.f32 %v3598_v16, %v5686_v33  ;;  %v3600_v59 = vpop.eup %3599  ;;  %v5695_v6 = vld [vmem:[#allocation53_spill] sm:$0xff]  ;;  %v5696_v25 = vld [vmem:[#allocation30_spill] sm:$0xff] }
 0x61d   :  { %2946 = vst [vmem:[#allocation8 + $0xb0] sm:$0xff] %v2882_v19  ;;  %2947 = vst [vmem:[#allocation8 + $0xb8] sm:$0xff] %v2883_v63  ;;  %v2897_v15 = vmul.f32 %v3598_v16, %v5687_v23  ;;  %v2898_v32 = vmul.f32 %v3598_v16, %v5688_v55  ;;  %v2899_v51 = vmul.f32 %v3598_v16, %v2587_v2  ;;  %v5697_v19 = vld [vmem:[#allocation34_spill] sm:$0xff] }
 0x61e   :  { %2964 = vst [vmem:[#allocation8 + $0x140] sm:$0xff] %v2900_v35  ;;  %2965 = vst [vmem:[#allocation8 + $0x148] sm:$0xff] %v2901_v3  ;;  %v2600_v9 = vmul.f32 %v5202_v21, %v5689_v4  ;;  %v2602_v12 = vmul.f32 %v5240_v13, %v5690_v1  ;;  %v2603_v31 = vmul.f32 %v5294_v50, %v5691_v40  ;;  %v5692_v21 = vld [vmem:[#allocation40_spill] sm:$0xff]  ;;  %v5698_v35 = vld [vmem:[#allocation62_spill] sm:$0xff] }
 0x61f   :  { %2966 = vst [vmem:[#allocation8 + $0x150] sm:$0xff] %v2902_v26  ;;  %2967 = vst [vmem:[#allocation8 + $0x158] sm:$0xff] %v2903_v58  ;;  %v2837_v57 = vadd.f32 %v5402_v56, %v5405_v14  ;;  %v2908_v2 = vmul.f32 %v3600_v59, %v5325_v53  ;;  %v2909_v28 = vmul.f32 %v3600_v59, %v5692_v21  ;;  %v5699_v26 = vld [vmem:[#allocation63_spill] sm:$0xff] }
 0x620   :  { %2968 = vst [vmem:[#allocation8 + $0x160] sm:$0xff] %v2904_v44  ;;  %2969 = vst [vmem:[#allocation8 + $0x168] sm:$0xff] %v2905_v36  ;;  %v2910_v13 = vmul.f32 %v3600_v59, %v5365_v41  ;;  %v2911_v8 = vmul.f32 %v3600_v59, %v5350_v7  ;;  %v2912_v17 = vmul.f32 %v3600_v59, %v2600_v9  ;;  %v5700_v44 = vld [vmem:[#allocation65_spill] sm:$0xff]  ;;  %v5701_v36 = vld [vmem:[#allocation64_spill] sm:$0xff] }
 0x621   :  { %2970 = vst [vmem:[#allocation8 + $0x170] sm:$0xff] %v2906_v34  ;;  %2971 = vst [vmem:[#allocation8 + $0x178] sm:$0xff] %v2907_v30  ;;  %v2913_v49 = vmul.f32 %v3600_v59, %v5378_v5  ;;  %v2914_v48 = vmul.f32 %v3600_v59, %v2602_v12  ;;  %v2915_v50 = vmul.f32 %v3600_v59, %v2603_v31  ;;  %v2838_v56 = vrot.slane %v2837_v57, 4 }
 0x622   :  { %2956 = vst [vmem:[#allocation8 + $0x100] sm:$0xff] %v2892_v47  ;;  %2957 = vst [vmem:[#allocation8 + $0x108] sm:$0xff] %v2893_v22  ;;  %v2605_v5 = vmul.f32 %v5255_v61, %v5693_v54  ;;  %v2604_v62 = vmul.f32 %v5695_v6, %v5694_v43  ;;  %v2607_v24 = vmul.f32 %v5310_v27, %v5696_v25 }
 0x623   :  { %2958 = vst [vmem:[#allocation8 + $0x110] sm:$0xff] %v2894_v46  ;;  %2959 = vst [vmem:[#allocation8 + $0x118] sm:$0xff] %v2895_v20  ;;  %v2839_v53 = vadd.f32 %v2838_v56, %v2837_v57  ;;  %v2606_v63 = vmul.f32 %v5302_v10, %v5697_v19  ;;  %v2609_v3 = vmul.f32 %v5327_v38, %v5698_v35 }
 0x624   :  { %2960 = vst [vmem:[#allocation8 + $0x120] sm:$0xff] %v2896_v60  ;;  %2961 = vst [vmem:[#allocation8 + $0x128] sm:$0xff] %v2897_v15  ;;  %v2608_v58 = vmul.f32 %v5329_v29, %v5699_v26  ;;  %v2610_v61 = vmul.f32 %v5341_v11, %v5700_v44  ;;  %v2611_v34 = vmul.f32 %v5369_v37, %v5701_v36 }
 0x625   :  { %2962 = vst [vmem:[#allocation8 + $0x130] sm:$0xff] %v2898_v32  ;;  %2963 = vst [vmem:[#allocation8 + $0x138] sm:$0xff] %v2899_v51  ;;  %v2840_v14 = vrot.slane %v2839_v53, 2 }
 0x626   :  { %2972 = vst [vmem:[#allocation8 + $0x180] sm:$0xff] %v2908_v2  ;;  %2973 = vst [vmem:[#allocation8 + $0x188] sm:$0xff] %v2909_v28 }
 0x627   :  { %2974 = vst [vmem:[#allocation8 + $0x190] sm:$0xff] %v2910_v13  ;;  %2975 = vst [vmem:[#allocation8 + $0x198] sm:$0xff] %v2911_v8  ;;  %v2841_v42 = vadd.f32 %v2840_v14, %v2839_v53 }
 0x628   :  { %2976 = vst [vmem:[#allocation8 + $0x1a0] sm:$0xff] %v2912_v17  ;;  %2977 = vst [vmem:[#allocation8 + $0x1a8] sm:$0xff] %v2913_v49 }
 0x629   :  { %2978 = vst [vmem:[#allocation8 + $0x1b0] sm:$0xff] %v2914_v48  ;;  %2979 = vst [vmem:[#allocation8 + $0x1b8] sm:$0xff] %v2915_v50  ;;  %v2842_v41 = vrot.slane %v2841_v42, 1 }
 0x62b   :  { %v2843_v18 = vadd.f32 %v2842_v41, %v2841_v42 }
 0x62d   :  { %v2851_v7 = vmax.f32 %v2843_v18, 1e-24 }
 0x62f   :  { %3601 = vrsqrt.f32 %v2851_v7 }
 0x639   :  { %v3602_v16 = vpop.eup %3601 }
 0x63a   :  { %v2916_v30 = vmul.f32 %v3602_v16, %v2604_v62  ;;  %v2917_v27 = vmul.f32 %v3602_v16, %v2605_v5  ;;  %v2918_v39 = vmul.f32 %v3602_v16, %v2606_v63  ;;  %v2919_v47 = vmul.f32 %v3602_v16, %v2607_v24 }
 0x63b   :  { %v2920_v10 = vmul.f32 %v3602_v16, %v2608_v58  ;;  %v2921_v45 = vmul.f32 %v3602_v16, %v2609_v3  ;;  %v2922_v22 = vmul.f32 %v3602_v16, %v2610_v61  ;;  %v2923_v0 = vmul.f32 %v3602_v16, %v2611_v34 }
 0x63c   :  { %2980 = vst [vmem:[#allocation8 + $0x1c0] sm:$0xff] %v2916_v30  ;;  %2981 = vst [vmem:[#allocation8 + $0x1c8] sm:$0xff] %v2917_v27 }
 0x63d   :  { %2982 = vst [vmem:[#allocation8 + $0x1d0] sm:$0xff] %v2918_v39  ;;  %2983 = vst [vmem:[#allocation8 + $0x1d8] sm:$0xff] %v2919_v47 }
 0x63e   :  { %2984 = vst [vmem:[#allocation8 + $0x1e0] sm:$0xff] %v2920_v10  ;;  %2985 = vst [vmem:[#allocation8 + $0x1e8] sm:$0xff] %v2921_v45 }
 0x63f   :  { %2986 = vst [vmem:[#allocation8 + $0x1f0] sm:$0xff] %v2922_v22  ;;  %2987 = vst [vmem:[#allocation8 + $0x1f8] sm:$0xff] %v2923_v0 }
 0x640   :  { %3680 = shalt.err (!%p3677_p0)
}
 0x641   :  { %s3681_s27 = scalar_lea.hbm %s5470_s3, 8192 }
 0x642   :  { %p3682_p1 = scmp.ne.s32.totalorder %s5470_s3, %s3681_s27  ;;  %p3685_p2 = scmp.lt.u32.totalorder %s3681_s27, %s5470_s3 }
 0x644   :  { %p3687_p3 = pnand %p3685_p2, %p3682_p1 }
 0x646   :  { %3690 = shalt.err (!%p3687_p3)
}
 0x647   :  { %2999 = dma.vmem_to_hbm [thread:$0]  %s2994_s23, 8192, %s5470_s3, [#allocation4], %s3701_s1, %s3701_s1, %s3702_s9  }
 0x648   :  { %3695 = dma.done.wait [#allocation4], 8192  }
 0x649   :  { %3696 = vsyncadd [#allocation4], 4294959104 }
 0x64a   :  { %3003 = vsyncpa [#allocation3], 1 }
 0x64b   :  { %3004 = vsyncpa [#allocation6], 1 }
 0x64c   :  { %3005 = vsyncpa [#allocation4], 1 }

</bundles_post_ra>
